<compile_context>
chip_gen: v5e
topology: v5e:2x2
jax: 0.10.0
libtpu: 0.0.40
codegen_flags: <defaults>
</compile_context>

<pallas_src>
import functools

import jax
import jax.numpy as jnp
from jax import lax
from jax.experimental import pallas as pl
from jax.experimental.pallas import tpu as pltpu


# ----------------------------------------------------------------------------
# Generic fused  out = act(x @ w + b)  Pallas kernel (used for conv1 and fc)
# ----------------------------------------------------------------------------
def _matmul_bias_act_kernel(x_ref, w_ref, b_ref, o_ref, *, relu):
    acc = jnp.dot(x_ref[...], w_ref[...], preferred_element_type=jnp.float32)
    acc = acc + b_ref[...]              # (1, N) broadcasts over rows, f32
    if relu:
        acc = jnp.maximum(acc, 0.0)
    o_ref[...] = acc.astype(o_ref.dtype)


def matmul_bias_act(x, w, b, relu, *, tm=256):
    """x: (M, K), w: (K, N), b: (N,) -> (M, N) f32.  bf16 operands, f32 acc."""
    M, K = x.shape
    K2, N = w.shape
    assert K == K2, (K, K2)
    tm = min(tm, pl.cdiv(M, 8) * 8)          # single block when M is small
    Mp = pl.cdiv(M, tm) * tm
    if Mp != M:                              # pad rows so the grid tiles evenly
        x = jnp.pad(x, ((0, Mp - M), (0, 0)))
    b2 = b.reshape(1, N).astype(jnp.float32)
    kernel = functools.partial(_matmul_bias_act_kernel, relu=relu)
    out = pl.pallas_call(
        kernel,
        out_shape=jax.ShapeDtypeStruct((Mp, N), jnp.float32),
        grid=(Mp // tm,),
        in_specs=[
            pl.BlockSpec((tm, K), lambda i: (i, 0)),
            pl.BlockSpec((K, N), lambda i: (0, 0)),
            pl.BlockSpec((1, N), lambda i: (0, 0)),
        ],
        out_specs=pl.BlockSpec((tm, N), lambda i: (i, 0)),
        compiler_params=pltpu.CompilerParams(dimension_semantics=("parallel",)),
        cost_estimate=pl.CostEstimate(
            flops=2 * Mp * K * N, transcendentals=0,
            bytes_accessed=2 * (Mp * K + K * N) + 4 * Mp * N),
    )(x.astype(jnp.bfloat16), w.astype(jnp.bfloat16), b2)
    return out[:M]


# ----------------------------------------------------------------------------
# Fused conv2 (stride 2) + depth x convDepth (stride 1) kernel.
#
# Layout trick: the 7x7 activation is kept in a VMEM scratch `xp` of shape
# (88, 32) bf16 holding the ZERO-PADDED 9x9 image flattened row-major:
#   xp[(h+1)*9 + (w+1), :] = act[h, w, :]   (all other rows are zero).
# A 3x3 tap (kh, kw) then only needs the contiguous slice
#   xp[kh*9 + kw : kh*9 + kw + 63, :]
# which, row q = h*9 + w, gives exactly the shifted input for output (h, w)
# (rows with w in {7,8} are wrap garbage and are masked to zero each layer,
# which simultaneously re-establishes the zero padding invariant).
# ----------------------------------------------------------------------------
def _fused_conv2_depth_kernel(p2_ref, w2_ref, b2_ref, wd_ref, bd_ref, mask_ref,
                              out_ref, xp_ref, *, depth):
    f32 = jnp.float32
    mask = mask_ref[...]                                   # (63, 1) f32

    # Re-initialise the padded scratch for this sample (halo rows stay zero).
    xp_ref[...] = jnp.zeros_like(xp_ref)

    # conv2 (16->32, stride 2) as one matmul on pre-built "wide" patches.
    y = jnp.dot(p2_ref[0], w2_ref[...], preferred_element_type=f32)  # (63, 32)
    y = jnp.maximum(y + b2_ref[...], 0.0) * mask
    xp_ref[pl.ds(10, 63), :] = y.astype(xp_ref.dtype)

    # Hoisted bias broadcast (JAX does not CSE broadcast_in_dim inside loops).
    bias_full = jnp.broadcast_to(bd_ref[...], (63, 32)).astype(f32)

    def body(step, carry):
        acc = bias_full
        for t in range(9):                                 # 9 taps, static unroll
            base = (t // 3) * 9 + (t % 3)
            a = xp_ref[pl.ds(base, 63), :]                 # shifted view, bf16
            acc = acc + jnp.dot(a, wd_ref[t], preferred_element_type=f32)
        acc = jnp.maximum(acc, 0.0) * mask                 # ReLU + kill wrap rows
        xp_ref[pl.ds(10, 63), :] = acc.astype(xp_ref.dtype)
        return carry

    lax.fori_loop(0, depth, body, 0)

    out_ref[0] = xp_ref[pl.ds(10, 63), :].astype(out_ref.dtype)


def fused_conv2_depth(patches2, w2, b2, wd_taps, bd, depth):
    """patches2: (B, 63, 144); w2: (144, 32); wd_taps: (9, 32, 32) -> (B, 63, 32)."""
    B = patches2.shape[0]
    mask = (jnp.arange(63) % 9 < 7).astype(jnp.float32).reshape(63, 1)
    kernel = functools.partial(_fused_conv2_depth_kernel, depth=depth)
    flops = 2 * B * 63 * (144 * 32 + depth * 9 * 32 * 32)
    return pl.pallas_call(
        kernel,
        out_shape=jax.ShapeDtypeStruct((B, 63, 32), jnp.float32),
        grid=(B,),
        in_specs=[
            pl.BlockSpec((1, 63, 144), lambda b: (b, 0, 0)),
            pl.BlockSpec((144, 32), lambda b: (0, 0)),
            pl.BlockSpec((1, 32), lambda b: (0, 0)),
            pl.BlockSpec((9, 32, 32), lambda b: (0, 0, 0)),
            pl.BlockSpec((1, 32), lambda b: (0, 0)),
            pl.BlockSpec((63, 1), lambda b: (0, 0)),
        ],
        out_specs=pl.BlockSpec((1, 63, 32), lambda b: (b, 0, 0)),
        scratch_shapes=[pltpu.VMEM((88, 32), jnp.bfloat16)],
        compiler_params=pltpu.CompilerParams(dimension_semantics=("parallel",)),
        cost_estimate=pl.CostEstimate(
            flops=flops, transcendentals=0,
            bytes_accessed=B * (63 * 144 * 2 + 63 * 32 * 4)
                           + 2 * (144 * 32 + 9 * 32 * 32)),
    )(patches2.astype(jnp.bfloat16), w2, b2.reshape(1, 32).astype(jnp.float32),
      wd_taps, bd.reshape(1, 32).astype(jnp.float32), mask)


# ----------------------------------------------------------------------------
# Plain-JAX glue (runs once per forward): im2col for the two strided convs.
# ----------------------------------------------------------------------------
def _im2col_conv1(x):
    """x: (B, 1, 28, 28) -> (B*196, 9); rows (b, oh, ow), cols (kh, kw)."""
    B = x.shape[0]
    xp = jnp.pad(x, ((0, 0), (0, 0), (1, 1), (1, 1)))              # (B,1,30,30)
    cols = [xp[:, 0, kh:kh + 28:2, kw:kw + 28:2]
            for kh in range(3) for kw in range(3)]                 # each (B,14,14)
    p = jnp.stack(cols, axis=-1)                                   # (B,14,14,9)
    return p.reshape(B * 196, 9)


def _im2col_conv2_wide(y1):
    """y1: (B,14,14,16) NHWC -> (B, 63, 144) 'wide' (7x9) patch rows.

    Columns ordered (ci, kh, kw) to match the torch weight reshape; the two
    extra columns per image row are zero and get masked inside the kernel."""
    B = y1.shape[0]
    yp = jnp.pad(y1, ((0, 0), (1, 1), (1, 1), (0, 0)))             # (B,16,16,16)
    taps = [yp[:, kh:kh + 13:2, kw:kw + 13:2, :]
            for kh in range(3) for kw in range(3)]                 # each (B,7,7,16)
    p = jnp.stack(taps, axis=3)                                    # (B,7,7,9,16)
    p = p.transpose(0, 1, 2, 4, 3).reshape(B, 7, 7, 144)           # cols ci*9 + t
    p = jnp.pad(p, ((0, 0), (0, 0), (0, 2), (0, 0)))               # widen 7 -> 9
    return p.reshape(B, 63, 144)


# ----------------------------------------------------------------------------
# Parameters (stored in PyTorch layouts) + one-time kernel-friendly prep.
# ----------------------------------------------------------------------------
def init_params(d, key):
    ks = jax.random.split(key, 8)

    def conv_w(k, cout, cin, kk):
        fan_in = cin * kk * kk
        return jax.random.normal(k, (cout, cin, kk, kk), jnp.float32) / jnp.sqrt(
            jnp.float32(fan_in))

    return {
        "conv1_w": conv_w(ks[0], 16, 1, 3),
        "conv1_b": 0.01 * jax.random.normal(ks[1], (16,), jnp.float32),
        "conv2_w": conv_w(ks[2], 32, 16, 3),
        "conv2_b": 0.01 * jax.random.normal(ks[3], (32,), jnp.float32),
        "convd_w": conv_w(ks[4], 32, 32, 3),
        "convd_b": 0.01 * jax.random.normal(ks[5], (32,), jnp.float32),
        "fc_w": jax.random.normal(ks[6], (d, 32 * 7 * 7), jnp.float32)
        / jnp.sqrt(jnp.float32(32 * 7 * 7)),
        "fc_b": 0.01 * jax.random.normal(ks[7], (d,), jnp.float32),
    }


def prepare_params(params):
    """One-time conversion to kernel layouts (bf16 weights, permuted fc)."""
    d = params["fc_w"].shape[0]
    w1 = params["conv1_w"].reshape(16, 9).T.astype(jnp.bfloat16)           # (9,16)
    w2 = params["conv2_w"].reshape(32, 16 * 9).T.astype(jnp.bfloat16)      # (144,32)
    wd = params["convd_w"].transpose(2, 3, 1, 0).reshape(9, 32, 32).astype(
        jnp.bfloat16)                                                      # (9,32,32)
    # torch.nn.Flatten is NCHW (c*49 + h*7 + w); our features are HWC
    # ((h*7+w)*32 + c), so permute the fc weight columns once here.
    wfc = (params["fc_w"].reshape(d, 32, 7, 7)
           .transpose(2, 3, 1, 0).reshape(49 * 32, d).astype(jnp.bfloat16))
    return {
        "w1": w1, "b1": params["conv1_b"].astype(jnp.float32),
        "w2": w2, "b2": params["conv2_b"].astype(jnp.float32),
        "wd": wd, "bd": params["convd_b"].astype(jnp.float32),
        "wfc": wfc, "bfc": params["fc_b"].astype(jnp.float32),
    }


# ----------------------------------------------------------------------------
# Encoder_depth forward
# ----------------------------------------------------------------------------
def encoder_depth_forward(prep, x, depth):
    B = x.shape[0]
    # conv1: 1->16, stride 2, pad 1 (28x28 -> 14x14), ReLU  [Pallas matmul]
    p1 = _im2col_conv1(x)                                          # (B*196, 9)
    y1 = matmul_bias_act(p1, prep["w1"], prep["b1"], relu=True)    # (B*196, 16)
    y1 = y1.reshape(B, 14, 14, 16)                                 # NHWC
    # conv2 (16->32, stride 2) + depth x convDepth, fused; activation in VMEM.
    p2 = _im2col_conv2_wide(y1)                                    # (B, 63, 144)
    feat = fused_conv2_depth(p2, prep["w2"], prep["b2"],
                             prep["wd"], prep["bd"], depth)        # (B, 63, 32)
    # Drop the two wrap columns; flatten in HWC order (fc weight pre-permuted).
    feat = feat.reshape(B, 7, 9, 32)[:, :, :7, :].reshape(B, 49 * 32)
    # fc: 1568 -> d (no activation)  [Pallas matmul]
    return matmul_bias_act(feat, prep["wfc"], prep["bfc"], relu=False)


# ----------------------------------------------------------------------------
# Pure-JAX f32 reference of the exact PyTorch forward (for validation).
# ----------------------------------------------------------------------------
def reference_forward(params, x, depth):
    dn = ("NCHW", "OIHW", "NCHW")

    def conv(y, w, b, stride):
        y = lax.conv_general_dilated(y, w, (stride, stride),
                                     ((1, 1), (1, 1)), dimension_numbers=dn)
        return jax.nn.relu(y + b.reshape(1, -1, 1, 1))

    y = conv(x, params["conv1_w"], params["conv1_b"], 2)
    y = conv(y, params["conv2_w"], params["conv2_b"], 2)
    for _ in range(depth):
        y = conv(y, params["convd_w"], params["convd_b"], 1)
    y = y.reshape(x.shape[0], -1)                      # NCHW flatten
    return y @ params["fc_w"].T + params["fc_b"]


if __name__ == "__main__":
    d, depth = 8, 2
    key = jax.random.PRNGKey(0)
    k_params, k_x = jax.random.split(key)
    params = init_params(d, k_params)
    prep = prepare_params(params)
    # MNIST-shaped input (required by the 32*7*7 fc): small batch of 2.
    x = jax.random.normal(k_x, (2, 1, 28, 28), jnp.float32)

    fwd = jax.jit(encoder_depth_forward, static_argnames=("depth",))
    out = jax.block_until_ready(fwd(prep, x, depth=depth))

    assert out.shape == (2, d), out.shape
    assert bool(jnp.all(jnp.isfinite(out)))

    # Validate the fused/per-tap/bf16 pipeline against an f32 reference.
    ref = reference_forward(params, x, depth)
    max_err = float(jnp.max(jnp.abs(out - ref)))
    assert max_err < 1e-1, f"mismatch vs f32 reference: {max_err}"

    print("KERNEL_OK")
</pallas_src>

<mosaic_0001>
module attributes {stable_mosaic.version = 11 : i64} {
  func.func @_matmul_bias_act_kernel(%arg0: i32, %arg1: memref<256x9xbf16, #tpu.memory_space<vmem>>, %arg2: memref<9x16xbf16, #tpu.memory_space<vmem>>, %arg3: memref<1x16xf32, #tpu.memory_space<vmem>>, %arg4: memref<256x16xf32, #tpu.memory_space<vmem>>) attributes {dimension_semantics = [#tpu.dimension_semantics<parallel>], iteration_bounds = array<i64: 2>, scalar_prefetch = 0 : i64, scratch_operands = 0 : i64, tpu.core_type = #tpu.core_type<tc>, window_params = [{transform_indices = @transform_0, window_bounds = array<i64: 256, 9>}, {pipeline_mode = #tpu.pipeline_mode<synchronous>, transform_indices = @transform_1, window_bounds = array<i64: 9, 16>}, {pipeline_mode = #tpu.pipeline_mode<synchronous>, transform_indices = @transform_2, window_bounds = array<i64: 1, 16>}, {transform_indices = @transform_3, window_bounds = array<i64: 256, 16>}]} {
    %c0 = arith.constant 0 : index
    %c0_0 = arith.constant 0 : index
    %0 = vector.load %arg1[%c0, %c0_0] : memref<256x9xbf16, #tpu.memory_space<vmem>>, vector<256x9xbf16>
    %c0_1 = arith.constant 0 : index
    %c0_2 = arith.constant 0 : index
    %1 = vector.load %arg2[%c0_1, %c0_2] : memref<9x16xbf16, #tpu.memory_space<vmem>>, vector<9x16xbf16>
    %cst = arith.constant dense<0.000000e+00> : vector<256x16xf32>
    %2 = tpu.matmul %0, %1, %cst {dimension_numbers = #tpu.dot_dimension_numbers<[1], [0], [0], [1], [0, 0, 1, 1], [], []>} : vector<256x9xbf16>, vector<9x16xbf16>, vector<256x16xf32> -> vector<256x16xf32>
    %c0_3 = arith.constant 0 : index
    %c0_4 = arith.constant 0 : index
    %3 = vector.load %arg3[%c0_3, %c0_4] : memref<1x16xf32, #tpu.memory_space<vmem>>, vector<1x16xf32>
    %4 = vector.broadcast %3 : vector<1x16xf32> to vector<256x16xf32>
    %5 = arith.addf %2, %4 : vector<256x16xf32>
    %cst_5 = arith.constant 0.000000e+00 : f32
    %6 = vector.broadcast %cst_5 : f32 to vector<256x16xf32>
    %7 = arith.maximumf %5, %6 : vector<256x16xf32>
    %c0_6 = arith.constant 0 : index
    %c0_7 = arith.constant 0 : index
    %8 = vector.load %arg4[%c0_6, %c0_7] : memref<256x16xf32, #tpu.memory_space<vmem>>, vector<256x16xf32>
    tpu.vector_store %arg4[%c0_6, %c0_7], %7 {strides = array<i32>} : memref<256x16xf32, #tpu.memory_space<vmem>>, vector<256x16xf32>,
    return
  }
  func.func @transform_0(%arg0: i32) -> (i32, i32) {
    %c0_i32 = arith.constant 0 : i32
    %c0_i32_0 = arith.constant 0 : i32
    return %arg0, %c0_i32 : i32, i32
  }
  func.func @transform_1(%arg0: i32) -> (i32, i32) {
    %c0_i32 = arith.constant 0 : i32
    %c0_i32_0 = arith.constant 0 : i32
    %c0_i32_1 = arith.constant 0 : i32
    return %c0_i32, %c0_i32_0 : i32, i32
  }
  func.func @transform_2(%arg0: i32) -> (i32, i32) {
    %c0_i32 = arith.constant 0 : i32
    %c0_i32_0 = arith.constant 0 : i32
    %c0_i32_1 = arith.constant 0 : i32
    return %c0_i32, %c0_i32_0 : i32, i32
  }
  func.func @transform_3(%arg0: i32) -> (i32, i32) {
    %c0_i32 = arith.constant 0 : i32
    %c0_i32_0 = arith.constant 0 : i32
    return %arg0, %c0_i32 : i32, i32
  }
}

module attributes {stable_mosaic.version = 11 : i64} {
  func.func @_fused_conv2_depth_kernel(%arg0: i32, %arg1: memref<1x63x144xbf16, #tpu.memory_space<vmem>>, %arg2: memref<144x32xbf16, #tpu.memory_space<vmem>>, %arg3: memref<1x32xf32, #tpu.memory_space<vmem>>, %arg4: memref<9x32x32xbf16, #tpu.memory_space<vmem>>, %arg5: memref<1x32xf32, #tpu.memory_space<vmem>>, %arg6: memref<63x1xf32, #tpu.memory_space<vmem>>, %arg7: memref<1x63x32xf32, #tpu.memory_space<vmem>>, %arg8: memref<88x32xbf16, #tpu.memory_space<vmem>>) attributes {dimension_semantics = [#tpu.dimension_semantics<parallel>], iteration_bounds = array<i64: 2>, scalar_prefetch = 0 : i64, scratch_operands = 1 : i64, tpu.core_type = #tpu.core_type<tc>, window_params = [{transform_indices = @transform_0, window_bounds = array<i64: 1, 63, 144>}, {pipeline_mode = #tpu.pipeline_mode<synchronous>, transform_indices = @transform_1, window_bounds = array<i64: 144, 32>}, {pipeline_mode = #tpu.pipeline_mode<synchronous>, transform_indices = @transform_2, window_bounds = array<i64: 1, 32>}, {pipeline_mode = #tpu.pipeline_mode<synchronous>, transform_indices = @transform_3, window_bounds = array<i64: 9, 32, 32>}, {pipeline_mode = #tpu.pipeline_mode<synchronous>, transform_indices = @transform_4, window_bounds = array<i64: 1, 32>}, {pipeline_mode = #tpu.pipeline_mode<synchronous>, transform_indices = @transform_5, window_bounds = array<i64: 63, 1>}, {transform_indices = @transform_6, window_bounds = array<i64: 1, 63, 32>}]} {
    %c0 = arith.constant 0 : index
    %c0_0 = arith.constant 0 : index
    %0 = vector.load %arg6[%c0, %c0_0] : memref<63x1xf32, #tpu.memory_space<vmem>>, vector<63x1xf32>
    %cst = arith.constant 0.000000e+00 : bf16
    %1 = vector.broadcast %cst : bf16 to vector<88x32xbf16>
    %c0_1 = arith.constant 0 : index
    %c0_2 = arith.constant 0 : index
    %2 = vector.load %arg8[%c0_1, %c0_2] : memref<88x32xbf16, #tpu.memory_space<vmem>>, vector<88x32xbf16>
    tpu.vector_store %arg8[%c0_1, %c0_2], %1 {strides = array<i32>} : memref<88x32xbf16, #tpu.memory_space<vmem>>, vector<88x32xbf16>,
    %c0_3 = arith.constant 0 : index
    %c0_4 = arith.constant 0 : index
    %c0_5 = arith.constant 0 : index
    %3 = vector.load %arg1[%c0_3, %c0_4, %c0_5] : memref<1x63x144xbf16, #tpu.memory_space<vmem>>, vector<1x63x144xbf16>
    %4 = vector.shape_cast %3 : vector<1x63x144xbf16> to vector<63x144xbf16>
    %c0_6 = arith.constant 0 : index
    %c0_7 = arith.constant 0 : index
    %5 = vector.load %arg2[%c0_6, %c0_7] : memref<144x32xbf16, #tpu.memory_space<vmem>>, vector<144x32xbf16>
    %cst_8 = arith.constant dense<0.000000e+00> : vector<63x32xf32>
    %6 = tpu.matmul %4, %5, %cst_8 {dimension_numbers = #tpu.dot_dimension_numbers<[1], [0], [0], [1], [0, 0, 1, 1], [], []>} : vector<63x144xbf16>, vector<144x32xbf16>, vector<63x32xf32> -> vector<63x32xf32>
    %c0_9 = arith.constant 0 : index
    %c0_10 = arith.constant 0 : index
    %7 = vector.load %arg3[%c0_9, %c0_10] : memref<1x32xf32, #tpu.memory_space<vmem>>, vector<1x32xf32>
    %8 = vector.broadcast %7 : vector<1x32xf32> to vector<63x32xf32>
    %9 = arith.addf %6, %8 : vector<63x32xf32>
    %cst_11 = arith.constant 0.000000e+00 : f32
    %10 = vector.broadcast %cst_11 : f32 to vector<63x32xf32>
    %11 = arith.maximumf %9, %10 : vector<63x32xf32>
    %12 = vector.broadcast %0 : vector<63x1xf32> to vector<63x32xf32>
    %13 = arith.mulf %11, %12 : vector<63x32xf32>
    %14 = arith.truncf %13 : vector<63x32xf32> to vector<63x32xbf16>
    %c10 = arith.constant 10 : index
    %c0_12 = arith.constant 0 : index
    %15 = vector.load %arg8[%c10, %c0_12] : memref<88x32xbf16, #tpu.memory_space<vmem>>, vector<63x32xbf16>
    tpu.vector_store %arg8[%c10, %c0_12], %14 {strides = array<i32>} : memref<88x32xbf16, #tpu.memory_space<vmem>>, vector<63x32xbf16>,
    %c0_13 = arith.constant 0 : index
    %c0_14 = arith.constant 0 : index
    %16 = vector.load %arg5[%c0_13, %c0_14] : memref<1x32xf32, #tpu.memory_space<vmem>>, vector<1x32xf32>
    %17 = vector.shape_cast %16 : vector<1x32xf32> to vector<1x32xf32>
    %18 = vector.broadcast %17 : vector<1x32xf32> to vector<63x32xf32>
    %c0_i32 = arith.constant 0 : i32
    %c2_i32 = arith.constant 2 : i32
    %19 = arith.addi %c0_i32, %c2_i32 : i32
    %c1_i32 = arith.constant 1 : i32
    scf.for %arg9 = %c0_i32 to %19 step %c1_i32  : i32 {
      %c0_20 = arith.constant 0 : index
      %c0_21 = arith.constant 0 : index
      %25 = vector.load %arg8[%c0_20, %c0_21] : memref<88x32xbf16, #tpu.memory_space<vmem>>, vector<63x32xbf16>
      %c0_22 = arith.constant 0 : index
      %c0_23 = arith.constant 0 : index
      %c0_24 = arith.constant 0 : index
      %26 = vector.load %arg4[%c0_22, %c0_23, %c0_24] : memref<9x32x32xbf16, #tpu.memory_space<vmem>>, vector<1x32x32xbf16>
      %27 = vector.shape_cast %26 : vector<1x32x32xbf16> to vector<32x32xbf16>
      %cst_25 = arith.constant dense<0.000000e+00> : vector<63x32xf32>
      %28 = tpu.matmul %25, %27, %cst_25 {dimension_numbers = #tpu.dot_dimension_numbers<[1], [0], [0], [1], [0, 0, 1, 1], [], []>} : vector<63x32xbf16>, vector<32x32xbf16>, vector<63x32xf32> -> vector<63x32xf32>
      %29 = arith.addf %18, %28 : vector<63x32xf32>
      %c1 = arith.constant 1 : index
      %c0_26 = arith.constant 0 : index
      %30 = vector.load %arg8[%c1, %c0_26] : memref<88x32xbf16, #tpu.memory_space<vmem>>, vector<63x32xbf16>
      %c1_27 = arith.constant 1 : index
      %c0_28 = arith.constant 0 : index
      %c0_29 = arith.constant 0 : index
      %31 = vector.load %arg4[%c1_27, %c0_28, %c0_29] : memref<9x32x32xbf16, #tpu.memory_space<vmem>>, vector<1x32x32xbf16>
      %32 = vector.shape_cast %31 : vector<1x32x32xbf16> to vector<32x32xbf16>
      %cst_30 = arith.constant dense<0.000000e+00> : vector<63x32xf32>
      %33 = tpu.matmul %30, %32, %cst_30 {dimension_numbers = #tpu.dot_dimension_numbers<[1], [0], [0], [1], [0, 0, 1, 1], [], []>} : vector<63x32xbf16>, vector<32x32xbf16>, vector<63x32xf32> -> vector<63x32xf32>
      %34 = arith.addf %29, %33 : vector<63x32xf32>
      %c2 = arith.constant 2 : index
      %c0_31 = arith.constant 0 : index
      %35 = vector.load %arg8[%c2, %c0_31] : memref<88x32xbf16, #tpu.memory_space<vmem>>, vector<63x32xbf16>
      %c2_32 = arith.constant 2 : index
      %c0_33 = arith.constant 0 : index
      %c0_34 = arith.constant 0 : index
      %36 = vector.load %arg4[%c2_32, %c0_33, %c0_34] : memref<9x32x32xbf16, #tpu.memory_space<vmem>>, vector<1x32x32xbf16>
      %37 = vector.shape_cast %36 : vector<1x32x32xbf16> to vector<32x32xbf16>
      %cst_35 = arith.constant dense<0.000000e+00> : vector<63x32xf32>
      %38 = tpu.matmul %35, %37, %cst_35 {dimension_numbers = #tpu.dot_dimension_numbers<[1], [0], [0], [1], [0, 0, 1, 1], [], []>} : vector<63x32xbf16>, vector<32x32xbf16>, vector<63x32xf32> -> vector<63x32xf32>
      %39 = arith.addf %34, %38 : vector<63x32xf32>
      %c9 = arith.constant 9 : index
      %c0_36 = arith.constant 0 : index
      %40 = vector.load %arg8[%c9, %c0_36] : memref<88x32xbf16, #tpu.memory_space<vmem>>, vector<63x32xbf16>
      %c3 = arith.constant 3 : index
      %c0_37 = arith.constant 0 : index
      %c0_38 = arith.constant 0 : index
      %41 = vector.load %arg4[%c3, %c0_37, %c0_38] : memref<9x32x32xbf16, #tpu.memory_space<vmem>>, vector<1x32x32xbf16>
      %42 = vector.shape_cast %41 : vector<1x32x32xbf16> to vector<32x32xbf16>
      %cst_39 = arith.constant dense<0.000000e+00> : vector<63x32xf32>
      %43 = tpu.matmul %40, %42, %cst_39 {dimension_numbers = #tpu.dot_dimension_numbers<[1], [0], [0], [1], [0, 0, 1, 1], [], []>} : vector<63x32xbf16>, vector<32x32xbf16>, vector<63x32xf32> -> vector<63x32xf32>
      %44 = arith.addf %39, %43 : vector<63x32xf32>
      %c10_40 = arith.constant 10 : index
      %c0_41 = arith.constant 0 : index
      %45 = vector.load %arg8[%c10_40, %c0_41] : memref<88x32xbf16, #tpu.memory_space<vmem>>, vector<63x32xbf16>
      %c4 = arith.constant 4 : index
      %c0_42 = arith.constant 0 : index
      %c0_43 = arith.constant 0 : index
      %46 = vector.load %arg4[%c4, %c0_42, %c0_43] : memref<9x32x32xbf16, #tpu.memory_space<vmem>>, vector<1x32x32xbf16>
      %47 = vector.shape_cast %46 : vector<1x32x32xbf16> to vector<32x32xbf16>
      %cst_44 = arith.constant dense<0.000000e+00> : vector<63x32xf32>
      %48 = tpu.matmul %45, %47, %cst_44 {dimension_numbers = #tpu.dot_dimension_numbers<[1], [0], [0], [1], [0, 0, 1, 1], [], []>} : vector<63x32xbf16>, vector<32x32xbf16>, vector<63x32xf32> -> vector<63x32xf32>
      %49 = arith.addf %44, %48 : vector<63x32xf32>
      %c11 = arith.constant 11 : index
      %c0_45 = arith.constant 0 : index
      %50 = vector.load %arg8[%c11, %c0_45] : memref<88x32xbf16, #tpu.memory_space<vmem>>, vector<63x32xbf16>
      %c5 = arith.constant 5 : index
      %c0_46 = arith.constant 0 : index
      %c0_47 = arith.constant 0 : index
      %51 = vector.load %arg4[%c5, %c0_46, %c0_47] : memref<9x32x32xbf16, #tpu.memory_space<vmem>>, vector<1x32x32xbf16>
      %52 = vector.shape_cast %51 : vector<1x32x32xbf16> to vector<32x32xbf16>
      %cst_48 = arith.constant dense<0.000000e+00> : vector<63x32xf32>
      %53 = tpu.matmul %50, %52, %cst_48 {dimension_numbers = #tpu.dot_dimension_numbers<[1], [0], [0], [1], [0, 0, 1, 1], [], []>} : vector<63x32xbf16>, vector<32x32xbf16>, vector<63x32xf32> -> vector<63x32xf32>
      %54 = arith.addf %49, %53 : vector<63x32xf32>
      %c18 = arith.constant 18 : index
      %c0_49 = arith.constant 0 : index
      %55 = vector.load %arg8[%c18, %c0_49] : memref<88x32xbf16, #tpu.memory_space<vmem>>, vector<63x32xbf16>
      %c6 = arith.constant 6 : index
      %c0_50 = arith.constant 0 : index
      %c0_51 = arith.constant 0 : index
      %56 = vector.load %arg4[%c6, %c0_50, %c0_51] : memref<9x32x32xbf16, #tpu.memory_space<vmem>>, vector<1x32x32xbf16>
      %57 = vector.shape_cast %56 : vector<1x32x32xbf16> to vector<32x32xbf16>
      %cst_52 = arith.constant dense<0.000000e+00> : vector<63x32xf32>
      %58 = tpu.matmul %55, %57, %cst_52 {dimension_numbers = #tpu.dot_dimension_numbers<[1], [0], [0], [1], [0, 0, 1, 1], [], []>} : vector<63x32xbf16>, vector<32x32xbf16>, vector<63x32xf32> -> vector<63x32xf32>
      %59 = arith.addf %54, %58 : vector<63x32xf32>
      %c19 = arith.constant 19 : index
      %c0_53 = arith.constant 0 : index
      %60 = vector.load %arg8[%c19, %c0_53] : memref<88x32xbf16, #tpu.memory_space<vmem>>, vector<63x32xbf16>
      %c7 = arith.constant 7 : index
      %c0_54 = arith.constant 0 : index
      %c0_55 = arith.constant 0 : index
      %61 = vector.load %arg4[%c7, %c0_54, %c0_55] : memref<9x32x32xbf16, #tpu.memory_space<vmem>>, vector<1x32x32xbf16>
      %62 = vector.shape_cast %61 : vector<1x32x32xbf16> to vector<32x32xbf16>
      %cst_56 = arith.constant dense<0.000000e+00> : vector<63x32xf32>
      %63 = tpu.matmul %60, %62, %cst_56 {dimension_numbers = #tpu.dot_dimension_numbers<[1], [0], [0], [1], [0, 0, 1, 1], [], []>} : vector<63x32xbf16>, vector<32x32xbf16>, vector<63x32xf32> -> vector<63x32xf32>
      %64 = arith.addf %59, %63 : vector<63x32xf32>
      %c20 = arith.constant 20 : index
      %c0_57 = arith.constant 0 : index
      %65 = vector.load %arg8[%c20, %c0_57] : memref<88x32xbf16, #tpu.memory_space<vmem>>, vector<63x32xbf16>
      %c8 = arith.constant 8 : index
      %c0_58 = arith.constant 0 : index
      %c0_59 = arith.constant 0 : index
      %66 = vector.load %arg4[%c8, %c0_58, %c0_59] : memref<9x32x32xbf16, #tpu.memory_space<vmem>>, vector<1x32x32xbf16>
      %67 = vector.shape_cast %66 : vector<1x32x32xbf16> to vector<32x32xbf16>
      %cst_60 = arith.constant dense<0.000000e+00> : vector<63x32xf32>
      %68 = tpu.matmul %65, %67, %cst_60 {dimension_numbers = #tpu.dot_dimension_numbers<[1], [0], [0], [1], [0, 0, 1, 1], [], []>} : vector<63x32xbf16>, vector<32x32xbf16>, vector<63x32xf32> -> vector<63x32xf32>
      %69 = arith.addf %64, %68 : vector<63x32xf32>
      %cst_61 = arith.constant 0.000000e+00 : f32
      %70 = vector.broadcast %cst_61 : f32 to vector<63x32xf32>
      %71 = arith.maximumf %69, %70 : vector<63x32xf32>
      %72 = vector.broadcast %0 : vector<63x1xf32> to vector<63x32xf32>
      %73 = arith.mulf %71, %72 : vector<63x32xf32>
      %74 = arith.truncf %73 : vector<63x32xf32> to vector<63x32xbf16>
      %c10_62 = arith.constant 10 : index
      %c0_63 = arith.constant 0 : index
      %75 = vector.load %arg8[%c10_62, %c0_63] : memref<88x32xbf16, #tpu.memory_space<vmem>>, vector<63x32xbf16>
      tpu.vector_store %arg8[%c10_62, %c0_63], %74 {strides = array<i32>} : memref<88x32xbf16, #tpu.memory_space<vmem>>, vector<63x32xbf16>,
    }
    %c10_15 = arith.constant 10 : index
    %c0_16 = arith.constant 0 : index
    %20 = vector.load %arg8[%c10_15, %c0_16] : memref<88x32xbf16, #tpu.memory_space<vmem>>, vector<63x32xbf16>
    %21 = arith.extf %20 : vector<63x32xbf16> to vector<63x32xf32>
    %c0_17 = arith.constant 0 : index
    %c0_18 = arith.constant 0 : index
    %c0_19 = arith.constant 0 : index
    %22 = vector.load %arg7[%c0_17, %c0_18, %c0_19] : memref<1x63x32xf32, #tpu.memory_space<vmem>>, vector<1x63x32xf32>
    %23 = vector.shape_cast %22 : vector<1x63x32xf32> to vector<63x32xf32>
    %24 = vector.shape_cast %21 : vector<63x32xf32> to vector<1x63x32xf32>
    tpu.vector_store %arg7[%c0_17, %c0_18, %c0_19], %24 {strides = array<i32>} : memref<1x63x32xf32, #tpu.memory_space<vmem>>, vector<1x63x32xf32>,
    return
  }
  func.func @transform_0(%arg0: i32) -> (i32, i32, i32) {
    %c0_i32 = arith.constant 0 : i32
    %c0_i32_0 = arith.constant 0 : i32
    %c0_i32_1 = arith.constant 0 : i32
    return %arg0, %c0_i32, %c0_i32_0 : i32, i32, i32
  }
  func.func @transform_1(%arg0: i32) -> (i32, i32) {
    %c0_i32 = arith.constant 0 : i32
    %c0_i32_0 = arith.constant 0 : i32
    %c0_i32_1 = arith.constant 0 : i32
    return %c0_i32, %c0_i32_0 : i32, i32
  }
  func.func @transform_2(%arg0: i32) -> (i32, i32) {
    %c0_i32 = arith.constant 0 : i32
    %c0_i32_0 = arith.constant 0 : i32
    %c0_i32_1 = arith.constant 0 : i32
    return %c0_i32, %c0_i32_0 : i32, i32
  }
  func.func @transform_3(%arg0: i32) -> (i32, i32, i32) {
    %c0_i32 = arith.constant 0 : i32
    %c0_i32_0 = arith.constant 0 : i32
    %c0_i32_1 = arith.constant 0 : i32
    %c0_i32_2 = arith.constant 0 : i32
    return %c0_i32, %c0_i32_0, %c0_i32_1 : i32, i32, i32
  }
  func.func @transform_4(%arg0: i32) -> (i32, i32) {
    %c0_i32 = arith.constant 0 : i32
    %c0_i32_0 = arith.constant 0 : i32
    %c0_i32_1 = arith.constant 0 : i32
    return %c0_i32, %c0_i32_0 : i32, i32
  }
  func.func @transform_5(%arg0: i32) -> (i32, i32) {
    %c0_i32 = arith.constant 0 : i32
    %c0_i32_0 = arith.constant 0 : i32
    %c0_i32_1 = arith.constant 0 : i32
    return %c0_i32, %c0_i32_0 : i32, i32
  }
  func.func @transform_6(%arg0: i32) -> (i32, i32, i32) {
    %c0_i32 = arith.constant 0 : i32
    %c0_i32_0 = arith.constant 0 : i32
    %c0_i32_1 = arith.constant 0 : i32
    return %arg0, %c0_i32, %c0_i32_0 : i32, i32, i32
  }
}

module attributes {stable_mosaic.version = 11 : i64} {
  func.func @_matmul_bias_act_kernel(%arg0: i32, %arg1: memref<8x1568xbf16, #tpu.memory_space<vmem>>, %arg2: memref<1568x8xbf16, #tpu.memory_space<vmem>>, %arg3: memref<1x8xf32, #tpu.memory_space<vmem>>, %arg4: memref<8x8xf32, #tpu.memory_space<vmem>>) attributes {dimension_semantics = [#tpu.dimension_semantics<parallel>], iteration_bounds = array<i64: 1>, scalar_prefetch = 0 : i64, scratch_operands = 0 : i64, tpu.core_type = #tpu.core_type<tc>, window_params = [{transform_indices = @transform_0, window_bounds = array<i64: 8, 1568>}, {pipeline_mode = #tpu.pipeline_mode<synchronous>, transform_indices = @transform_1, window_bounds = array<i64: 1568, 8>}, {pipeline_mode = #tpu.pipeline_mode<synchronous>, transform_indices = @transform_2, window_bounds = array<i64: 1, 8>}, {transform_indices = @transform_3, window_bounds = array<i64: 8, 8>}]} {
    %c0 = arith.constant 0 : index
    %c0_0 = arith.constant 0 : index
    %0 = vector.load %arg1[%c0, %c0_0] : memref<8x1568xbf16, #tpu.memory_space<vmem>>, vector<8x1568xbf16>
    %c0_1 = arith.constant 0 : index
    %c0_2 = arith.constant 0 : index
    %1 = vector.load %arg2[%c0_1, %c0_2] : memref<1568x8xbf16, #tpu.memory_space<vmem>>, vector<1568x8xbf16>
    %cst = arith.constant dense<0.000000e+00> : vector<8x8xf32>
    %2 = tpu.matmul %0, %1, %cst {dimension_numbers = #tpu.dot_dimension_numbers<[1], [0], [0], [1], [0, 0, 1, 1], [], []>} : vector<8x1568xbf16>, vector<1568x8xbf16>, vector<8x8xf32> -> vector<8x8xf32>
    %c0_3 = arith.constant 0 : index
    %c0_4 = arith.constant 0 : index
    %3 = vector.load %arg3[%c0_3, %c0_4] : memref<1x8xf32, #tpu.memory_space<vmem>>, vector<1x8xf32>
    %4 = vector.broadcast %3 : vector<1x8xf32> to vector<8x8xf32>
    %5 = arith.addf %2, %4 : vector<8x8xf32>
    %c0_5 = arith.constant 0 : index
    %c0_6 = arith.constant 0 : index
    %6 = vector.load %arg4[%c0_5, %c0_6] : memref<8x8xf32, #tpu.memory_space<vmem>>, vector<8x8xf32>
    tpu.vector_store %arg4[%c0_5, %c0_6], %5 {strides = array<i32>} : memref<8x8xf32, #tpu.memory_space<vmem>>, vector<8x8xf32>,
    return
  }
  func.func @transform_0(%arg0: i32) -> (i32, i32) {
    %c0_i32 = arith.constant 0 : i32
    %c0_i32_0 = arith.constant 0 : i32
    return %arg0, %c0_i32 : i32, i32
  }
  func.func @transform_1(%arg0: i32) -> (i32, i32) {
    %c0_i32 = arith.constant 0 : i32
    %c0_i32_0 = arith.constant 0 : i32
    %c0_i32_1 = arith.constant 0 : i32
    return %c0_i32, %c0_i32_0 : i32, i32
  }
  func.func @transform_2(%arg0: i32) -> (i32, i32) {
    %c0_i32 = arith.constant 0 : i32
    %c0_i32_0 = arith.constant 0 : i32
    %c0_i32_1 = arith.constant 0 : i32
    return %c0_i32, %c0_i32_0 : i32, i32
  }
  func.func @transform_3(%arg0: i32) -> (i32, i32) {
    %c0_i32 = arith.constant 0 : i32
    %c0_i32_0 = arith.constant 0 : i32
    return %arg0, %c0_i32 : i32, i32
  }
}

</mosaic_0001>

<bundles_post_ra>
// kernel: encoder_depth_forward.3
= control target key start
LH: loop header
LB: loop body
LE: loop exit
PB: predicated region body
PF: predicated region fallthrough
CT: control target
= control target key end

     0   :  { %s718_s12 = smov 0   ;;  %s864_s0 = inlined_call_operand.vmem [shape: bf16[512,9], index: 0, kind: input, shape index: {}]   ;;  %s865_s1 = inlined_call_operand.vmem [shape: bf16[9,16], index: 1, kind: input, shape index: {}]   ;;  %s866_s2 = inlined_call_operand.vmem [shape: f32[1,16], index: 2, kind: input, shape index: {}]   ;;  %s867_s3 = inlined_call_operand.vmem [shape: f32[512,16], index: 3, kind: output, shape index: {}]  }
   0x1 LB: > { %s564_s13 = sadd.s32 4294967295, %s695_s12   ;;  %p568_p0 = scmp.ge.s32.totalorder %s695_s12, 1  ;;  %s695_s12 = sphi %s718_s12, %s13_s12  }
   0x2   : > { %p138_p1 = scmp.lt.s32.totalorder %s695_s12, 3 }
   0x4   : > { %p139_p2 = pnand %p568_p0, %p138_p1 }
   0x5   : > { %s569_s18 = sshll.u32 (!%p139_p2), %s564_s13, 5 }
   0x6   : > { %142 = sbr.rel (%p139_p2) target bundleno = 215 (0xd7), region = 32  ;;  %p163_p3 = scmp.lt.s32.totalorder (!%p139_p2), %s569_s18, 63 }
   0xb   : > { %v639_v0 = vld [vmem:[%s865_s1] sm:$0xf]  ;;  %v675_v1 = vld [vmem:[%s865_s1] sm:$0x10]  ;;  %vm347_vm0 = vcmask 1043456   ;;  %vm348_vm1 = vcmask 1044480  }
   0xc   : > { %v640_v2 = vor.u32 %v675_v1, %v639_v0  ;;  %v697_v3 = vmov 65535   ;;  %s869_s18 = smov (!%p163_p3, %s569_s18), 63  ;;  %vm298_vm2 = vcmask 72704   ;;  %v757_v23 = vld [vmem:[%s866_s2] ss:$0 sm:$0xff]  ;;  %vm475_vm3 = vcmask 130048  }
   0xd   : > { %v349_v4 = vsel %vm347_vm0, 4294967295, %v697_v3  ;;  %s570_s19 = sshll.u32 %s869_s18, 2  ;;  %s572_s25 = sshll.u32 %s869_s18, 3 }
   0xe   : > { %v350_v5 = vsel %vm348_vm1, %v349_v4, 0  ;;  %s166_s22 = scalar_lea.vmem %s864_s0, %s570_s19  ;;  %s765_s28 = scalar_lea.vmem %s867_s3, %s572_s25 }
   0xf   : > { %v352_v6 = vand.u32 %v640_v2, %v350_v5  ;;  %v659_v7 = vld [vmem:[%s166_s22] sm:$0xff]  ;;  %v660_v11 = vld [vmem:[%s166_s22 + $0x8] sm:$0xff]  ;;  %v661_v15 = vld [vmem:[%s166_s22 + $0x10] sm:$0xff] }
  0x10   : > { %v663_v8 = vld [vmem:[%s166_s22 + $0x20] sm:$0xff]  ;;  %v664_v12 = vld [vmem:[%s166_s22 + $0x28] sm:$0xff]  ;;  %v665_v16 = vld [vmem:[%s166_s22 + $0x30] sm:$0xff] }
  0x11   : > { %361 = vmatpush.bf16.msra.mxu0 %v352_v6  ;;  %676 = vmatpush.bf16.msra.mxu1 %v352_v6  ;;  %v667_v9 = vld [vmem:[%s166_s22 + $0x40] sm:$0xff]  ;;  %v668_v13 = vld [vmem:[%s166_s22 + $0x48] sm:$0xff]  ;;  %v669_v17 = vld [vmem:[%s166_s22 + $0x50] sm:$0xff] }
  0x12   : > { %677 = vmatpush.bf16.msra.mxu2 %v352_v6  ;;  %678 = vmatpush.bf16.msra.mxu3 %v352_v6  ;;  %v671_v10 = vld [vmem:[%s166_s22 + $0x60] sm:$0xff]  ;;  %v672_v14 = vld [vmem:[%s166_s22 + $0x68] sm:$0xff]  ;;  %v673_v18 = vld [vmem:[%s166_s22 + $0x70] sm:$0xff] }
  0x13   : > { %v662_v19 = vld [vmem:[%s166_s22 + $0x18] sm:$0xff] }
  0x14   : > { %641 = vmatmul.msk.bf16.vlgmr.msra.gmra.mxu0 %vm298_vm2, %v659_v7  ;;  %645 = vmatmul.msk.bf16.vlgmr.msra.gmra.mxu1 %vm298_vm2, %v663_v8  ;;  %v666_v20 = vld [vmem:[%s166_s22 + $0x38] sm:$0xff] }
  0x15   : > { %649 = vmatmul.msk.bf16.vlgmr.msra.gmra.mxu2 %vm298_vm2, %v667_v9  ;;  %653 = vmatmul.msk.bf16.vlgmr.msra.gmra.mxu3 %vm298_vm2, %v671_v10  ;;  %v670_v21 = vld [vmem:[%s166_s22 + $0x58] sm:$0xff] }
  0x16   : > { %v674_v22 = vld [vmem:[%s166_s22 + $0x78] sm:$0xff] }
  0x24   : > { %642 = vmatmul.msk.bf16.gmra.mxu0 %vm298_vm2, %v660_v11  ;;  %646 = vmatmul.msk.bf16.gmra.mxu1 %vm298_vm2, %v664_v12 }
  0x25   : > { %650 = vmatmul.msk.bf16.gmra.mxu2 %vm298_vm2, %v668_v13  ;;  %654 = vmatmul.msk.bf16.gmra.mxu3 %vm298_vm2, %v672_v14 }
  0x34   : > { %643 = vmatmul.msk.bf16.gmra.mxu0 %vm298_vm2, %v661_v15  ;;  %647 = vmatmul.msk.bf16.gmra.mxu1 %vm298_vm2, %v665_v16 }
  0x35   : > { %651 = vmatmul.msk.bf16.gmra.mxu2 %vm298_vm2, %v669_v17  ;;  %655 = vmatmul.msk.bf16.gmra.mxu3 %vm298_vm2, %v673_v18 }
  0x44   : > { %644 = vmatmul.msk.bf16.gmra.mxu0 %vm298_vm2, %v662_v19  ;;  %648 = vmatmul.msk.bf16.gmra.mxu1 %vm298_vm2, %v666_v20 }
  0x45   : > { %652 = vmatmul.msk.bf16.gmra.mxu2 %vm298_vm2, %v670_v21  ;;  %656 = vmatmul.msk.bf16.gmra.mxu3 %vm298_vm2, %v674_v22 }
  0x91   : > { %v363_v24 = vpop.f32.mrf.mxu0  ;;  %v383_v25 = vpop.f32.mrf.mxu1 }
  0x92   : > { %v364_v26 = vadd.f32 %v757_v23, %v363_v24  ;;  %v384_v27 = vadd.f32 %v757_v23, %v383_v25 }
  0x94   : > { %v443_v28 = vmax.f32 %v364_v26, 0.0  ;;  %v451_v29 = vmax.f32 %v384_v27, 0.0 }
  0x96   : > { %476 = vst.msk [vmem:[%s765_s28] sm:$0xff] %vm475_vm3, %v443_v28 }
  0x97   : > { %484 = vst.msk [vmem:[%s765_s28 + $0x40] sm:$0xff] %vm475_vm3, %v451_v29 }
  0x98   : > { %v403_v30 = vpop.f32.mrf.mxu2  ;;  %v423_v31 = vpop.f32.mrf.mxu3 }
  0x99   : > { %v404_v32 = vadd.f32 %v757_v23, %v403_v30  ;;  %v424_v33 = vadd.f32 %v757_v23, %v423_v31  ;;  %v365_v34 = vpop.f32.mrf.mxu0  ;;  %v385_v35 = vpop.f32.mrf.mxu1 }
  0x9a   : > { %v366_v36 = vadd.f32 %v757_v23, %v365_v34  ;;  %v386_v37 = vadd.f32 %v757_v23, %v385_v35 }
  0x9b   : > { %v459_v38 = vmax.f32 %v404_v32, 0.0  ;;  %v467_v39 = vmax.f32 %v424_v33, 0.0 }
  0x9c   : > { %v444_v40 = vmax.f32 %v366_v36, 0.0  ;;  %v452_v41 = vmax.f32 %v386_v37, 0.0 }
  0x9d   : > { %492 = vst.msk [vmem:[%s765_s28 + $0x80] sm:$0xff] %vm475_vm3, %v459_v38 }
  0x9e   : > { %500 = vst.msk [vmem:[%s765_s28 + $0xc0] sm:$0xff] %vm475_vm3, %v467_v39 }
  0x9f   : > { %477 = vst.msk [vmem:[%s765_s28 + $0x8] sm:$0xff] %vm475_vm3, %v444_v40 }
  0xa0   : > { %485 = vst.msk [vmem:[%s765_s28 + $0x48] sm:$0xff] %vm475_vm3, %v452_v41  ;;  %v405_v42 = vpop.f32.mrf.mxu2  ;;  %v425_v43 = vpop.f32.mrf.mxu3 }
  0xa1   : > { %v406_v44 = vadd.f32 %v757_v23, %v405_v42  ;;  %v426_v45 = vadd.f32 %v757_v23, %v425_v43  ;;  %v368_v46 = vpop.f32.mrf.mxu0  ;;  %v388_v47 = vpop.f32.mrf.mxu1 }
  0xa2   : > { %v369_v48 = vadd.f32 %v757_v23, %v368_v46  ;;  %v389_v49 = vadd.f32 %v757_v23, %v388_v47 }
  0xa3   : > { %v460_v50 = vmax.f32 %v406_v44, 0.0  ;;  %v468_v51 = vmax.f32 %v426_v45, 0.0 }
  0xa4   : > { %v445_v52 = vmax.f32 %v369_v48, 0.0  ;;  %v453_v53 = vmax.f32 %v389_v49, 0.0 }
  0xa5   : > { %493 = vst.msk [vmem:[%s765_s28 + $0x88] sm:$0xff] %vm475_vm3, %v460_v50 }
  0xa6   : > { %501 = vst.msk [vmem:[%s765_s28 + $0xc8] sm:$0xff] %vm475_vm3, %v468_v51 }
  0xa7   : > { %478 = vst.msk [vmem:[%s765_s28 + $0x10] sm:$0xff] %vm475_vm3, %v445_v52 }
  0xa8   : > { %486 = vst.msk [vmem:[%s765_s28 + $0x50] sm:$0xff] %vm475_vm3, %v453_v53  ;;  %v408_v54 = vpop.f32.mrf.mxu2  ;;  %v428_v55 = vpop.f32.mrf.mxu3 }
  0xa9   : > { %v409_v56 = vadd.f32 %v757_v23, %v408_v54  ;;  %v429_v57 = vadd.f32 %v757_v23, %v428_v55  ;;  %v370_v58 = vpop.f32.mrf.mxu0  ;;  %v390_v59 = vpop.f32.mrf.mxu1 }
  0xaa   : > { %v371_v60 = vadd.f32 %v757_v23, %v370_v58  ;;  %v391_v61 = vadd.f32 %v757_v23, %v390_v59 }
  0xab   : > { %v461_v62 = vmax.f32 %v409_v56, 0.0  ;;  %v469_v63 = vmax.f32 %v429_v57, 0.0 }
  0xac   : > { %v446_v0 = vmax.f32 %v371_v60, 0.0  ;;  %v454_v1 = vmax.f32 %v391_v61, 0.0 }
  0xad   : > { %494 = vst.msk [vmem:[%s765_s28 + $0x90] sm:$0xff] %vm475_vm3, %v461_v62 }
  0xae   : > { %502 = vst.msk [vmem:[%s765_s28 + $0xd0] sm:$0xff] %vm475_vm3, %v469_v63 }
  0xaf   : > { %479 = vst.msk [vmem:[%s765_s28 + $0x18] sm:$0xff] %vm475_vm3, %v446_v0 }
  0xb0   : > { %487 = vst.msk [vmem:[%s765_s28 + $0x58] sm:$0xff] %vm475_vm3, %v454_v1  ;;  %v410_v2 = vpop.f32.mrf.mxu2  ;;  %v430_v3 = vpop.f32.mrf.mxu3 }
  0xb1   : > { %v411_v4 = vadd.f32 %v757_v23, %v410_v2  ;;  %v431_v5 = vadd.f32 %v757_v23, %v430_v3  ;;  %v373_v6 = vpop.f32.mrf.mxu0  ;;  %v393_v7 = vpop.f32.mrf.mxu1 }
  0xb2   : > { %v374_v8 = vadd.f32 %v757_v23, %v373_v6  ;;  %v394_v9 = vadd.f32 %v757_v23, %v393_v7 }
  0xb3   : > { %v462_v10 = vmax.f32 %v411_v4, 0.0  ;;  %v470_v11 = vmax.f32 %v431_v5, 0.0 }
  0xb4   : > { %v447_v12 = vmax.f32 %v374_v8, 0.0  ;;  %v455_v13 = vmax.f32 %v394_v9, 0.0 }
  0xb5   : > { %495 = vst.msk [vmem:[%s765_s28 + $0x98] sm:$0xff] %vm475_vm3, %v462_v10 }
  0xb6   : > { %503 = vst.msk [vmem:[%s765_s28 + $0xd8] sm:$0xff] %vm475_vm3, %v470_v11 }
  0xb7   : > { %480 = vst.msk [vmem:[%s765_s28 + $0x20] sm:$0xff] %vm475_vm3, %v447_v12 }
  0xb8   : > { %488 = vst.msk [vmem:[%s765_s28 + $0x60] sm:$0xff] %vm475_vm3, %v455_v13  ;;  %v413_v14 = vpop.f32.mrf.mxu2  ;;  %v433_v15 = vpop.f32.mrf.mxu3 }
  0xb9   : > { %v414_v16 = vadd.f32 %v757_v23, %v413_v14  ;;  %v434_v17 = vadd.f32 %v757_v23, %v433_v15  ;;  %v375_v18 = vpop.f32.mrf.mxu0  ;;  %v395_v19 = vpop.f32.mrf.mxu1 }
  0xba   : > { %v376_v20 = vadd.f32 %v757_v23, %v375_v18  ;;  %v396_v21 = vadd.f32 %v757_v23, %v395_v19 }
  0xbb   : > { %v463_v22 = vmax.f32 %v414_v16, 0.0  ;;  %v471_v24 = vmax.f32 %v434_v17, 0.0 }
  0xbc   : > { %v448_v25 = vmax.f32 %v376_v20, 0.0  ;;  %v456_v26 = vmax.f32 %v396_v21, 0.0 }
  0xbd   : > { %496 = vst.msk [vmem:[%s765_s28 + $0xa0] sm:$0xff] %vm475_vm3, %v463_v22 }
  0xbe   : > { %504 = vst.msk [vmem:[%s765_s28 + $0xe0] sm:$0xff] %vm475_vm3, %v471_v24 }
  0xbf   : > { %481 = vst.msk [vmem:[%s765_s28 + $0x28] sm:$0xff] %vm475_vm3, %v448_v25 }
  0xc0   : > { %489 = vst.msk [vmem:[%s765_s28 + $0x68] sm:$0xff] %vm475_vm3, %v456_v26  ;;  %v415_v27 = vpop.f32.mrf.mxu2  ;;  %v435_v28 = vpop.f32.mrf.mxu3 }
  0xc1   : > { %v416_v29 = vadd.f32 %v757_v23, %v415_v27  ;;  %v436_v30 = vadd.f32 %v757_v23, %v435_v28  ;;  %v378_v31 = vpop.f32.mrf.mxu0  ;;  %v398_v32 = vpop.f32.mrf.mxu1 }
  0xc2   : > { %v379_v33 = vadd.f32 %v757_v23, %v378_v31  ;;  %v399_v34 = vadd.f32 %v757_v23, %v398_v32 }
  0xc3   : > { %v464_v35 = vmax.f32 %v416_v29, 0.0  ;;  %v472_v36 = vmax.f32 %v436_v30, 0.0 }
  0xc4   : > { %v449_v37 = vmax.f32 %v379_v33, 0.0  ;;  %v457_v38 = vmax.f32 %v399_v34, 0.0 }
  0xc5   : > { %497 = vst.msk [vmem:[%s765_s28 + $0xa8] sm:$0xff] %vm475_vm3, %v464_v35 }
  0xc6   : > { %505 = vst.msk [vmem:[%s765_s28 + $0xe8] sm:$0xff] %vm475_vm3, %v472_v36 }
  0xc7   : > { %482 = vst.msk [vmem:[%s765_s28 + $0x30] sm:$0xff] %vm475_vm3, %v449_v37 }
  0xc8   : > { %490 = vst.msk [vmem:[%s765_s28 + $0x70] sm:$0xff] %vm475_vm3, %v457_v38  ;;  %v418_v39 = vpop.f32.mrf.mxu2  ;;  %v438_v40 = vpop.f32.mrf.mxu3 }
  0xc9   : > { %v419_v41 = vadd.f32 %v757_v23, %v418_v39  ;;  %v439_v42 = vadd.f32 %v757_v23, %v438_v40  ;;  %v380_v43 = vpop.f32.mrf.mxu0  ;;  %v400_v44 = vpop.f32.mrf.mxu1 }
  0xca   : > { %v381_v45 = vadd.f32 %v757_v23, %v380_v43  ;;  %v401_v46 = vadd.f32 %v757_v23, %v400_v44 }
  0xcb   : > { %v465_v47 = vmax.f32 %v419_v41, 0.0  ;;  %v473_v48 = vmax.f32 %v439_v42, 0.0 }
  0xcc   : > { %v450_v49 = vmax.f32 %v381_v45, 0.0  ;;  %v458_v50 = vmax.f32 %v401_v46, 0.0 }
  0xcd   : > { %498 = vst.msk [vmem:[%s765_s28 + $0xb0] sm:$0xff] %vm475_vm3, %v465_v47 }
  0xce   : > { %506 = vst.msk [vmem:[%s765_s28 + $0xf0] sm:$0xff] %vm475_vm3, %v473_v48 }
  0xcf   : > { %483 = vst.msk [vmem:[%s765_s28 + $0x38] sm:$0xff] %vm475_vm3, %v450_v49 }
  0xd0   : > { %491 = vst.msk [vmem:[%s765_s28 + $0x78] sm:$0xff] %vm475_vm3, %v458_v50  ;;  %v420_v51 = vpop.f32.mrf.mxu2  ;;  %v440_v52 = vpop.f32.mrf.mxu3 }
  0xd1   : > { %v421_v53 = vadd.f32 %v757_v23, %v420_v51  ;;  %v441_v54 = vadd.f32 %v757_v23, %v440_v52 }
  0xd3   : > { %v466_v55 = vmax.f32 %v421_v53, 0.0  ;;  %v474_v56 = vmax.f32 %v441_v54, 0.0 }
  0xd5   : > { %499 = vst.msk [vmem:[%s765_s28 + $0xb8] sm:$0xff] %vm475_vm3, %v466_v55 }
  0xd6   : > { %507 = vst.msk [vmem:[%s765_s28 + $0xf8] sm:$0xff] %vm475_vm3, %v474_v56 }
  0xd7 PF: > { %s13_s12 = sadd.s32 1, %s695_s12  }
  0xd8   : > { %p10_p4 = scmp.ge.s32.totalorder %s13_s12, 4  }
  0xda   :  { %12 = sbr.rel (!%p10_p4) target bundleno = 1 (0x1), region = 62 }

// kernel: encoder_depth_forward.4
= control target key start
LH: loop header
LB: loop body
LE: loop exit
PB: predicated region body
PF: predicated region fallthrough
CT: control target
= control target key end

     0   :  { %s2135_s21 = smov 0   ;;  %s2622_s0 = inlined_call_operand.vmem [shape: bf16[2,63,144], index: 0, kind: input, shape index: {}]   ;;  %s2623_s1 = inlined_call_operand.vmem [shape: bf16[144,32], index: 1, kind: input, shape index: {}]   ;;  %s2624_s2 = inlined_call_operand.vmem [shape: f32[1,32], index: 2, kind: input, shape index: {}]   ;;  %s2625_s3 = inlined_call_operand.vmem [shape: bf16[9,32,32], index: 3, kind: input, shape index: {}]   ;;  %s2626_s4 = inlined_call_operand.vmem [shape: f32[1,32], index: 4, kind: input, shape index: {}]   ;;  %s2627_s5 = inlined_call_operand.vmem [shape: f32[63,1], index: 5, kind: input, shape index: {}]   ;;  %s2628_s6 = inlined_call_operand.vmem [shape: f32[2,63,32], index: 6, kind: output, shape index: {}]  }
   0x1 LB: > { %s1680_s22 = sadd.s32 4294967295, %s2093_s21   ;;  %p1684_p0 = scmp.ge.s32.totalorder %s2093_s21, 1  ;;  %s2093_s21 = sphi %s2135_s21, %s16_s21  }
   0x2   : > { %p212_p1 = scmp.lt.s32.totalorder %s2093_s21, 3 }
   0x4   : > { %p213_p2 = pnand %p1684_p0, %p212_p1 }
   0x6   : > { %216 = sbr.rel (%p213_p2) target bundleno = 519 (0x207), region = 44 }
   0xb   : > { %v1964_v0 = vld [vmem:[%s2623_s1 + $0x38] sm:$0xff]  ;;  %v1965_v1 = vld [vmem:[%s2623_s1 + $0x40] sm:$0xff]  ;;  %p242_p3 = scmp.lt.s32.totalorder %s1680_s22, 1  ;;  %v1963_v2 = vld [vmem:[%s2623_s1 + $0x30] sm:$0xff]  ;;  %vm393_vm0 = vcmask 130048   ;;  %v2099_v13 = vmov 0  }
   0xc   : > { %406 = vmatpush.bf16.msra.mxu0 %v1964_v0  ;;  %2046 = vmatpush.bf16.msra.mxu2 %v1964_v0  ;;  %v1962_v3 = vld [vmem:[%s2623_s1 + $0x28] sm:$0xff]  ;;  %v1961_v9 = vld [vmem:[%s2623_s1 + $0x20] sm:$0xff]  ;;  %v255_v11 = vld [vmem:[%s2627_s5 + $0x10] sm:$0xff]  ;;  %vm261_vm1 = vcmask 257024   ;;  %vm571_vm2 = vcmask 257025   ;;  %vm536_vm3 = vcmask 1040384  }
   0xd   : > { %s2645_s22 = smov (!%p242_p3, %s1680_s22), 1  ;;  %2054 = vmatpush.bf16.msra.mxu3 %v1965_v1  ;;  %442 = vmatpush.bf16.msra.mxu1 %v1965_v1  ;;  %v253_v12 = vld [vmem:[%s2627_s5] sm:$0xff]  ;;  %v1960_v14 = vld [vmem:[%s2623_s1 + $0x18] sm:$0xff]  ;;  %v1959_v15 = vld [vmem:[%s2623_s1 + $0x10] sm:$0xff]  ;;  %262 = vst.msk [vmem:[#allocation2] sm:$0xf] %vm261_vm1, %v2099_v13 }
   0xe   : > { %s1947_s29 = sshll.u32 %s2645_s22, 6  ;;  %2079 = vset.pattern.permute.xlu1 %v2099_v13  ;;  %2078 = vset.pattern.permute.xlu0 %v2099_v13  ;;  %v256_v17 = vld [vmem:[%s2627_s5 + $0x18] sm:$0xff]  ;;  %v254_v19 = vld [vmem:[%s2627_s5 + $0x8] sm:$0xff]  ;;  %v257_v20 = vld [vmem:[%s2627_s5 + $0x20] sm:$0xff]  ;;  %263 = vst.msk [vmem:[#allocation2 + $0x4] sm:$0xf] %vm261_vm1, %v2099_v13 }
   0xf   : > { %s2155_s8 = scalar_lea.vmem %s2622_s0, %s1947_s29  ;;  %s2160_s11 = scalar_lea.vmem %s2628_s6, %s1947_s29  ;;  %484 = vperm.xlu1 %2079, %v255_v11   ;;  %474 = vperm.xlu0 %2078, %v253_v12   ;;  %v1958_v22 = vld [vmem:[%s2623_s1 + $0x8] sm:$0xff]  ;;  %v1957_v23 = vld [vmem:[%s2623_s1] sm:$0xff]  ;;  %v260_v27 = vld [vmem:[%s2627_s5 + $0x38] sm:$0x7f]  ;;  %272 = vst.msk [vmem:[#allocation2 + $0x28] sm:$0xf] %vm261_vm1, %v2099_v13 }
  0x10   : > { %407 = vmatpush.bf16.msra.mxu0 %v1963_v2  ;;  %2047 = vmatpush.bf16.msra.mxu2 %v1963_v2  ;;  %v1951_v4 = vld [vmem:[%s2155_s8 + $0x14] sm:$0xf]  ;;  %v1701_v5 = vld [vmem:[%s2155_s8 + $0x18] sm:$0xf0]  ;;  %v1949_v7 = vld [vmem:[%s2155_s8 + $0x4] sm:$0xf] }
  0x11   : > { %v1704_v6 = vor.u32 %v1951_v4, %v1701_v5  ;;  %v1693_v8 = vld [vmem:[%s2155_s8 + $0x8] sm:$0xf0]  ;;  %2080 = vset.pattern.permute.xlu2 %v2099_v13  ;;  %v1953_v16 = vld [vmem:[%s2155_s8 + $0x24] sm:$0xf]  ;;  %v1691_v25 = vld [vmem:[%s2155_s8] sm:$0xf] }
  0x12   : > { %v1696_v10 = vor.u32 %v1949_v7, %v1693_v8  ;;  %v1709_v18 = vld [vmem:[%s2155_s8 + $0x28] sm:$0xf0]  ;;  %494 = vperm.xlu2 %2080, %v257_v20   ;;  %v1950_v26 = vld [vmem:[%s2155_s8 + $0x4] sm:$0xf0]  ;;  %v1707_v28 = vld [vmem:[%s2155_s8 + $0x20] sm:$0xf] }
  0x13   : > { %1758 = vmatmul.msk.bf16.vlgmr.msra.gmra.mxu3 %vm393_vm0, %v1704_v6  ;;  %v1712_v21 = vor.u32 %v1953_v16, %v1709_v18  ;;  %v258_v24 = vld [vmem:[%s2627_s5 + $0x28] sm:$0xff]  ;;  %v259_v30 = vld [vmem:[%s2627_s5 + $0x30] sm:$0xff]  ;;  %v1692_v31 = vor.u32 %v1950_v26, %v1691_v25  ;;  %v1717_v34 = vld [vmem:[%s2155_s8 + $0x38] sm:$0xf0]  ;;  %264 = vst.msk [vmem:[#allocation2 + $0x8] sm:$0xf] %vm261_vm1, %v2099_v13 }
  0x14   : > { %408 = vmatpush.bf16.msra.mxu0 %v1962_v3  ;;  %2048 = vmatpush.bf16.msra.mxu2 %v1962_v3  ;;  %v1954_v29 = vld [vmem:[%s2155_s8 + $0x24] sm:$0xf0]  ;;  %v1955_v33 = vld [vmem:[%s2155_s8 + $0x34] sm:$0xf]  ;;  %v1699_v36 = vld [vmem:[%s2155_s8 + $0x10] sm:$0xf] }
  0x15   : > { %1757 = vmatmul.msk.bf16.vlgmr.msra.gmra.mxu1 %vm393_vm0, %v1696_v10  ;;  %v1708_v32 = vor.u32 %v1954_v29, %v1707_v28  ;;  %v1720_v35 = vor.u32 %v1955_v33, %v1717_v34  ;;  %v1952_v37 = vld [vmem:[%s2155_s8 + $0x14] sm:$0xf0]  ;;  %v1715_v38 = vld [vmem:[%s2155_s8 + $0x30] sm:$0xf]  ;;  %265 = vst.msk [vmem:[#allocation2 + $0xc] sm:$0xf] %vm261_vm1, %v2099_v13 }
  0x16   : > { %v1956_v39 = vld [vmem:[%s2155_s8 + $0x34] sm:$0xf0]  ;;  %v1700_v40 = vor.u32 %v1952_v37, %v1699_v36  ;;  %266 = vst.msk [vmem:[#allocation2 + $0x10] sm:$0xf] %vm261_vm1, %v2099_v13  ;;  %v2254_v44 = vld [vmem:[%s2624_s2] ss:$0 sm:$0xff] }
  0x17   : > { %489 = vperm.xlu1 %2079, %v256_v17   ;;  %479 = vperm.xlu0 %2078, %v254_v19   ;;  %v1716_v41 = vor.u32 %v1956_v39, %v1715_v38  ;;  %267 = vst.msk [vmem:[#allocation2 + $0x14] sm:$0xf] %vm261_vm1, %v2099_v13  ;;  %v2271_v5 = vld [vmem:[%s2626_s4] ss:$0 sm:$0xff]  ;;  %vm537_vm4 = vcmask 1044484   ;;  %vm580_vm6 = vcmask 253952  }
  0x18   : > { %409 = vmatpush.bf16.msra.mxu0 %v1961_v9  ;;  %2049 = vmatpush.bf16.msra.mxu2 %v1961_v9  ;;  %268 = vst.msk [vmem:[#allocation2 + $0x18] sm:$0xf] %vm261_vm1, %v2099_v13  ;;  %vm2278_vm5 = vmor %vm536_vm3, %vm537_vm4  ;;  %vm581_vm7 = vsmask.f32 256  ;;  %s2327_s23 = smov 0  }
  0x19   : > { %269 = vst.msk [vmem:[#allocation2 + $0x1c] sm:$0xf] %vm261_vm1, %v2099_v13  ;;  %vm2318_vm8 = vmand %vm580_vm6, %vm581_vm7 }
  0x1a   : > { %499 = vperm.xlu2 %2080, %v258_v24   ;;  %270 = vst.msk [vmem:[#allocation2 + $0x20] sm:$0xf] %vm261_vm1, %v2099_v13 }
  0x1b   : > { %271 = vst.msk [vmem:[#allocation2 + $0x24] sm:$0xf] %vm261_vm1, %v2099_v13 }
  0x1c   : > { %410 = vmatpush.bf16.msra.mxu0 %v1960_v14  ;;  %2050 = vmatpush.bf16.msra.mxu2 %v1960_v14 }
  0x1f   : > { %509 = vperm.xlu1 %2079, %v260_v27   ;;  %504 = vperm.xlu0 %2078, %v259_v30  }
  0x20   : > { %411 = vmatpush.bf16.msra.mxu0 %v1959_v15  ;;  %2051 = vmatpush.bf16.msra.mxu2 %v1959_v15 }
  0x23   : > { %1759 = vmatmul.msk.bf16.gmra.mxu3 %vm393_vm0, %v1712_v21 }
  0x24   : > { %412 = vmatpush.bf16.msra.mxu0 %v1958_v22  ;;  %2052 = vmatpush.bf16.msra.mxu2 %v1958_v22 }
  0x28   : > { %413 = vmatpush.bf16.msra.mxu0 %v1957_v23  ;;  %2053 = vmatpush.bf16.msra.mxu2 %v1957_v23 }
  0x2b   : > { %414 = vmatmul.bf16.vlgmr.msra.gmra.mxu0 %v1692_v31  ;;  %424 = vmatmul.bf16.vlgmr.msra.gmra.mxu2 %v1708_v32 }
  0x33   : > { %1760 = vmatmul.msk.bf16.gmra.mxu3 %vm393_vm0, %v1720_v35 }
  0x3b   : > { %419 = vmatmul.bf16.gmra.mxu0 %v1700_v40  ;;  %429 = vmatmul.bf16.gmra.mxu2 %v1716_v41 }
  0x6c   : > { %v2261_v55 = vpop.permute.xlu2 %494 }
  0x74   : > { %v2282_v16 = vpop.permute.xlu2 %499 }
  0x81   : > { %v2257_v50 = vpop.permute.xlu0 %474  ;;  %v2275_v8 = vpop.permute.xlu1 %484 }
  0x89   : > { %v2266_v3 = vpop.permute.xlu0 %479  ;;  %v2291_v35 = vpop.permute.xlu1 %489 }
  0x91   : > { %v2296_v40 = vpop.permute.xlu0 %504 }
  0x92   : > { %v444_v45 = vpop.f32.mrf.mxu1  ;;  %2634 = vst [vmem:[#allocation3_spill] sm:$0xff] %v2296_v40 }
  0x96   : > { %v449_v42 = vpop.f32.mrf.mxu3 }
  0x9a   : > { %v446_v57 = vpop.f32.mrf.mxu1 }
  0x9e   : > { %v2249_v43 = vpop.f32.mrf.mxu3 }
  0xa6   : > { %v454_v48 = vpop.f32.mrf.mxu3 }
  0xa8   : > { %v415_v46 = vpop.f32.mrf.mxu0 }
  0xa9   : > { %v416_v47 = vadd.f32 %v2254_v44, %v415_v46 }
  0xab   : > { %v445_v49 = vadd.f32 %v444_v45, %v416_v47 }
  0xad   : > { %v464_v51 = vmax.f32 %v445_v49, 0.0 }
  0xae   : > { %v425_v52 = vpop.f32.mrf.mxu2  ;;  %v456_v0 = vpop.f32.mrf.mxu3 }
  0xaf   : > { %v512_v53 = vmul.f32 %v2257_v50, %v464_v51  ;;  %v426_v54 = vadd.f32 %v2254_v44, %v425_v52 }
  0xb0   : > { %v417_v56 = vpop.f32.mrf.mxu0 }
  0xb1   : > { %v520_v58 = vpack.c.bf16 %v512_v53, %v512_v53  ;;  %v455_v59 = vadd.f32 %v454_v48, %v426_v54  ;;  %v418_v60 = vadd.f32 %v2254_v44, %v417_v56 }
  0xb3   : > { %v539_v61 = vrot.slane %v520_v58, 7  ;;  %v447_v62 = vadd.f32 %v446_v57, %v418_v60  ;;  %v468_v63 = vmax.f32 %v455_v59, 0.0  ;;  %v2307_v60 = vpop.permute.xlu1 %509 }
  0xb4   : > { %2635 = vst [vmem:[#allocation4_spill] sm:$0xff] %v2307_v60 }
  0xb5   : > { %572 = vst.msk [vmem:[#allocation2 + $0x4] sm:$0xe] %vm571_vm2, %v539_v61  ;;  %v465_v1 = vmax.f32 %v447_v62, 0.0  ;;  %v516_v2 = vmul.f32 %v2261_v55, %v468_v63  ;;  %v540_v11 = vrot.slane %v539_v61, 4 }
  0xb6   : > { %v427_v4 = vpop.f32.mrf.mxu2  ;;  %v459_v24 = vpop.f32.mrf.mxu3 }
  0xb7   : > { %v513_v6 = vmul.f32 %v2266_v3, %v465_v1  ;;  %v428_v7 = vadd.f32 %v2254_v44, %v427_v4  ;;  %v524_v9 = vpack.c.bf16 %v516_v2, %v516_v2 }
  0xb8   : > { %v420_v10 = vpop.f32.mrf.mxu0 }
  0xb9   : > { %v521_v12 = vpack.c.bf16 %v513_v6, %v513_v6  ;;  %v457_v13 = vadd.f32 %v456_v0, %v428_v7  ;;  %v421_v14 = vadd.f32 %v2254_v44, %v420_v10  ;;  %v550_v20 = vrot.slane %v524_v9, 7  ;;  %v583_v7 = vld [vmem:[#allocation2 + $0x24] sm:$0x1] }
  0xba   : > { %v2636_v6 = vmov 0 }
  0xbb   : > { %v541_v17 = vrot.slane %v521_v12, 7  ;;  %v450_v18 = vadd.f32 %v449_v42, %v421_v14  ;;  %v469_v19 = vmax.f32 %v457_v13, 0.0  ;;  %v552_v29 = vrot.slane %v550_v20, 4 }
  0xbc   : > { %v2637_v6 = vsel %vm2318_vm8, 4294967295, %v2636_v6 }
  0xbd   : > { %v542_v21 = vsel %vm2278_vm5, %v540_v11, %v541_v17  ;;  %v466_v22 = vmax.f32 %v450_v18, 0.0  ;;  %v517_v23 = vmul.f32 %v2282_v16, %v469_v19  ;;  %v543_v36 = vrot.slane %v541_v17, 4  ;;  %2638 = vst [vmem:[#allocation5_spill] sm:$0xff] %v2637_v6 }
  0xbe   : > { %573 = vst.msk [vmem:[#allocation2 + $0x8] sm:$0xf] %vm261_vm1, %v542_v21  ;;  %v430_v25 = vpop.f32.mrf.mxu2  ;;  %v461_v52 = vpop.f32.mrf.mxu3 }
  0xbf   : > { %v514_v26 = vmul.f32 %v2275_v8, %v466_v22  ;;  %v525_v27 = vpack.c.bf16 %v517_v23, %v517_v23  ;;  %v431_v28 = vadd.f32 %v2254_v44, %v430_v25 }
  0xc0   : > { %v422_v30 = vpop.f32.mrf.mxu0 }
  0xc1   : > { %v522_v31 = vpack.c.bf16 %v514_v26, %v514_v26  ;;  %v553_v32 = vrot.slane %v525_v27, 7  ;;  %v460_v33 = vadd.f32 %v459_v24, %v431_v28  ;;  %v423_v34 = vadd.f32 %v2254_v44, %v422_v30 }
  0xc3   : > { %v544_v37 = vrot.slane %v522_v31, 7  ;;  %v554_v38 = vsel %vm2278_vm5, %v552_v29, %v553_v32  ;;  %v470_v39 = vmax.f32 %v460_v33, 0.0  ;;  %v452_v41 = vadd.f32 %v2249_v43, %v423_v34 }
  0xc4   : > { %577 = vst.msk [vmem:[#allocation2 + $0x18] sm:$0xf] %vm261_vm1, %v554_v38  ;;  %v555_v53 = vrot.slane %v553_v32, 4 }
  0xc5   : > { %v545_v42 = vsel %vm2278_vm5, %v543_v36, %v544_v37  ;;  %v518_v45 = vmul.f32 %v2296_v40, %v470_v39  ;;  %v467_v46 = vmax.f32 %v452_v41, 0.0  ;;  %v546_v59 = vrot.slane %v544_v37, 4 }
  0xc6   : > { %574 = vst.msk [vmem:[#allocation2 + $0xc] sm:$0xf] %vm261_vm1, %v545_v42  ;;  %v432_v47 = vpop.f32.mrf.mxu2 }
  0xc7   : > { %v526_v48 = vpack.c.bf16 %v518_v45, %v518_v45  ;;  %v433_v49 = vadd.f32 %v2254_v44, %v432_v47  ;;  %v515_v51 = vmul.f32 %v2291_v35, %v467_v46 }
  0xc9   : > { %v556_v54 = vrot.slane %v526_v48, 7  ;;  %v462_v56 = vadd.f32 %v461_v52, %v433_v49  ;;  %v523_v57 = vpack.c.bf16 %v515_v51, %v515_v51 }
  0xcb   : > { %v557_v43 = vsel %vm2278_vm5, %v555_v53, %v556_v54  ;;  %v471_v58 = vmax.f32 %v462_v56, 0.0  ;;  %v547_v61 = vrot.slane %v523_v57, 7  ;;  %v558_v2 = vrot.slane %v556_v54, 4 }
  0xcc   : > { %578 = vst.msk [vmem:[#allocation2 + $0x1c] sm:$0xf] %vm261_vm1, %v557_v43 }
  0xcd   : > { %v519_v62 = vmul.f32 %v2307_v60, %v471_v58  ;;  %v548_v44 = vsel %vm2278_vm5, %v546_v59, %v547_v61  ;;  %v549_v63 = vrot.slane %v547_v61, 4 }
  0xce   : > { %575 = vst.msk [vmem:[#allocation2 + $0x10] sm:$0xf] %vm261_vm1, %v548_v44 }
  0xcf   : > { %v527_v0 = vpack.c.bf16 %v519_v62, %v519_v62  ;;  %v551_v1 = vsel %vm2278_vm5, %v549_v63, %v550_v20 }
  0xd0   : > { %576 = vst.msk [vmem:[#allocation2 + $0x14] sm:$0xf] %vm261_vm1, %v551_v1 }
  0xd1   : > { %v559_v4 = vrot.slane %v527_v0, 7 }
  0xd3   : > { %v560_v9 = vsel %vm2278_vm5, %v558_v2, %v559_v4  ;;  %v561_v10 = vrot.slane %v559_v4, 4 }
  0xd4   : > { %579 = vst.msk [vmem:[#allocation2 + $0x20] sm:$0xf] %vm261_vm1, %v560_v9 }
  0xd5   : > { %v584_v11 = vsel %vm2318_vm8, %v561_v10, %v583_v7 }
  0xd6   : > { %585 = vst [vmem:[#allocation2 + $0x24] sm:$0x1] %v584_v11 }
  0xd7 LB: >> { %v1971_v12 = vld [vmem:[%s2625_s3 + $0x8] sm:$0xff]  ;;  %v1970_v13 = vld [vmem:[%s2625_s3] sm:$0xff]  ;;  %v1977_v17 = vld [vmem:[%s2625_s3 + $0x38] sm:$0xff]  ;;  %vm640_vm9 = vcmask 261120   ;;  %vm695_vm10 = vsmask.f32 7424  ;;  %s2097_s23 = sphi %s2327_s23, %s595_s23  }
  0xd8   : >> { %2055 = vmatpush.bf16.msra.mxu1 %v1971_v12  ;;  %2056 = vmatpush.bf16.msra.mxu2 %v1971_v12  ;;  %v1975_v14 = vld [vmem:[%s2625_s3 + $0x28] sm:$0xff]  ;;  %v2348_v20 = vld [vmem:[#allocation2 + $0x10] sm:$0xff]  ;;  %v785_v21 = vld [vmem:[#allocation2 + $0x4] sm:$0xf]  ;;  %vm821_vm11 = vcmask 1046528   ;;  %vm1444_vm13 = vcmask 1045504  }
  0xd9   : >> { %2057 = vmatpush.bf16.msra.mxu3 %v1971_v12  ;;  %659 = vmatpush.bf16.msra.mxu0 %v1971_v12  ;;  %v2344_v18 = vld [vmem:[#allocation2 + $0x8] sm:$0xff]   ;;  %v2351_v23 = vld [vmem:[#allocation2 + $0x18] sm:$0xff]  ;;  %v1966_v24 = vld [vmem:[#allocation2] sm:$0xff]  ;;  %v808_v25 = vunpack.c.l.b16 %v785_v21  ;;  %vm1108_vm12 = vsmask.f32 6400  ;;  %s595_s23 = sadd.s32 1, %s2097_s23  }
  0xda   : >> { %v2346_v19 = vld [vmem:[#allocation2 + $0x8] sm:$0xff]  ;;  %v1997_v22 = vunpack.c.l.b16 %v2344_v18  ;;  %v1973_v26 = vld [vmem:[%s2625_s3 + $0x18] sm:$0xff]  ;;  %v784_v28 = vld [vmem:[#allocation2] sm:$0xe]  ;;  %v698_v34 = vshll.u32 %v1966_v24, 16  ;;  %v696_v48 = vshrl.u32 %v1966_v24, 16 }
  0xdb   : >> { %v1983_v27 = vld [vmem:[%s2625_s3 + $0x48] sm:$0xff]  ;;  %v1974_v29 = vld [vmem:[%s2625_s3 + $0x20] sm:$0xff]  ;;  %v1976_v30 = vld [vmem:[%s2625_s3 + $0x30] sm:$0xff]  ;;  %v807_v37 = vunpack.c.l.b16 %v784_v28  ;;  %v702_v51 = vshll.u32 %v2346_v19, 16  ;;  %v823_v62 = vrot.slane %v2344_v18, 1  ;;  %v709_v18 = vshll.u32 %v2348_v20, 16 }
  0xdc   : >> { %2058 = vmatpush.bf16.msra.mxu1 %v1970_v13  ;;  %2059 = vmatpush.bf16.msra.mxu2 %v1970_v13  ;;  %v900_v31 = vpack.c.b16 %v1997_v22, %v808_v25  ;;  %v1990_v32 = vld [vmem:[%s2625_s3 + $0x68] sm:$0xff]  ;;  %v1992_v33 = vld [vmem:[%s2625_s3 + $0x78] sm:$0xff]  ;;  %v1972_v36 = vld [vmem:[%s2625_s3 + $0x10] sm:$0xff]  ;;  %v700_v49 = vrot.slane %v698_v34, 1  ;;  %p592_p4 = scmp.ge.s32.totalorder %s595_s23, 2  }
  0xdd   : >> { %2060 = vmatpush.bf16.msra.mxu3 %v1970_v13  ;;  %660 = vmatpush.bf16.msra.mxu0 %v1970_v13  ;;  %v1982_v38 = vld [vmem:[%s2625_s3 + $0x40] sm:$0xff]  ;;  %v2042_v39 = vld [vmem:[#allocation2 + $0xc] sm:$0xff]   ;;  %v1978_v45 = vld [vmem:[#allocation2 + $0x4] sm:$0xf0]  ;;  %v816_v52 = vpack.c.b16 %v808_v25, %v807_v37  ;;  %v704_v59 = vrot.slane %v702_v51, 1  ;;  %v713_v37 = vshrl.u32 %v2348_v20, 16 }
  0xde   : >> { %v907_v41 = vshll.u32 %v900_v31, 16  ;;  %v1843_v42 = vld [vmem:[#allocation2 + $0x4] sm:$0xe]  ;;  %v1985_v46 = vld [vmem:[%s2625_s3 + $0x58] sm:$0xff]  ;;  %v1994_v47 = vld [vmem:[%s2625_s3 + $0x88] sm:$0xff]  ;;  %v905_v53 = vshrl.u32 %v900_v31, 16  ;;  %v701_v58 = vor.u32 %v700_v49, %v696_v48 }
  0xdf   : >> { %1786 = vmatmul.msk.bf16.vlgmr.msra.gmra.mxu1 %vm640_vm9, %v2346_v19  ;;  %1787 = vmatmul.msk.bf16.vlgmr.msra.gmra.mxu2 %vm640_vm9, %v2348_v20  ;;  %v912_v56 = vshll.u32 %v2042_v39, 16  ;;  %v2391_v57 = vld [vmem:[#allocation2 + $0xc] sm:$0xff]  ;;  %v2393_v43 = vor.u32 %v1978_v45, %v1843_v42  ;;  %v822_v61 = vrot.slane %v816_v52, 1  ;;  %v1989_v10 = vld [vmem:[%s2625_s3 + $0x60] sm:$0xff]  ;;  %v2044_v13 = vld [vmem:[#allocation2 + $0x14] sm:$0xff]   ;;  %v916_v22 = vshrl.u32 %v2042_v39, 16 }
  0xe0   : >> { %861 = vmatpush.bf16.msrb.mxu2 %v1975_v14  ;;  %1788 = vmatmul.msk.bf16.vlgmr.msra.gmra.mxu3 %vm640_vm9, %v2351_v23  ;;  %v909_v54 = vrot.slane %v907_v41, 1  ;;  %v1034_v1 = vrot.slane %v2391_v57, 1  ;;  %v705_v2 = vsel %vm695_vm10, %v701_v58, %v704_v59  ;;  %v1991_v11 = vld [vmem:[%s2625_s3 + $0x70] sm:$0xff]  ;;  %v1993_v14 = vld [vmem:[%s2625_s3 + $0x80] sm:$0xff]  ;;  %v2021_v39 = vld [vmem:[#allocation2 + $0x18] sm:$0xff]   ;;  %v924_v41 = vshrl.u32 %v2044_v13, 16 }
  0xe1   : >> { %965 = vmatpush.bf16.msrb.mxu3 %v1977_v17  ;;  %1785 = vmatmul.msk.bf16.vlgmr.msra.gmra.mxu0 %vm640_vm9, %v1966_v24  ;;  %v914_v63 = vrot.slane %v912_v56, 1  ;;  %v1033_v0 = vrot.slane %v2393_v43, 1  ;;  %v824_v4 = vsel %vm821_vm11, %v822_v61, %v823_v62  ;;  %v1984_v12 = vld [vmem:[%s2625_s3 + $0x50] sm:$0xff]  ;;  %v706_v17 = vshrl.u32 %v2346_v19, 16  ;;  %v2433_v45 = vld [vmem:[#allocation2 + $0x1c] sm:$0xff] }
  0xe2   : >> { %753 = vmatpush.bf16.msrb.mxu1 %v1973_v26  ;;  %1072 = vmatpush.bf16.msrb.mxu0 %v1983_v27  ;;  %v910_v44 = vor.u32 %v909_v54, %v905_v53  ;;  %v2020_v21 = vld [vmem:[#allocation2 + $0x10] sm:$0xff]   ;;  %v920_v24 = vshll.u32 %v2044_v13, 16  ;;  %v711_v27 = vrot.slane %v709_v18, 1  ;;  %v827_v48 = vrot.slane %v2021_v39, 1  ;;  %v792_v58 = vld [vmem:[#allocation2 + $0x20] sm:$0x1] }
  0xe3   : >> { %v1035_v9 = vsel %vm821_vm11, %v1033_v0, %v1034_v1  ;;  %v2420_v25 = vld [vmem:[#allocation2 + $0x14] sm:$0xff]  ;;  %v708_v26 = vor.u32 %v706_v17, %v704_v59  ;;  %v825_v28 = vrot.slane %v2020_v21, 1  ;;  %v1038_v52 = vrot.slane %v2433_v45, 1  ;;  %v1004_v59 = vld [vmem:[#allocation2 + $0x24] sm:$0x1] }
  0xe4   : >> { %862 = vmatpush.bf16.msrb.mxu2 %v1974_v29  ;;  %v915_v7 = vsel %vm695_vm10, %v910_v44, %v914_v63  ;;  %v918_v29 = vor.u32 %v916_v22, %v914_v63  ;;  %v1036_v31 = vrot.slane %v2420_v25, 1  ;;  %v815_v61 = vunpack.c.l.b16 %v792_v58  ;;  %v1214_v0 = vld [vmem:[#allocation2 + $0x8] sm:$0xe]  ;;  %v1986_v21 = vld [vmem:[#allocation2 + $0x10] sm:$0xff]  ;;  %v1987_v58 = vld [vmem:[#allocation2 + $0x18] sm:$0xff] }
  0xe5   : >> { %966 = vmatpush.bf16.msrb.mxu3 %v1976_v30  ;;  %v922_v30 = vrot.slane %v920_v24, 1  ;;  %v828_v54 = vsel %vm821_vm11, %v825_v28, %v827_v48  ;;  %v1431_v22 = vld [vmem:[#allocation2 + $0x8] sm:$0xc]  ;;  %v1113_v24 = vshll.u32 %v2393_v43, 16  ;;  %vm1608_vm14 = vcmask (%p592_p4), 261122  }
  0xe6   : >> { %754 = vmatpush.bf16.msrb.mxu1 %v1972_v36  ;;  %1073 = vmatpush.bf16.msrb.mxu0 %v1982_v38  ;;  %v1037_v34 = vsel %vm821_vm11, %v1034_v1, %v1036_v31  ;;  %v2045_v36 = vld [vmem:[#allocation2 + $0x1c] sm:$0xff]  ;;  %v716_v38 = vshll.u32 %v2351_v23, 16  ;;  %v1039_v56 = vsel %vm821_vm11, %v1036_v31, %v1038_v52  ;;  %v820_v44 = vpack.c.b16 %v815_v61, %v815_v61  ;;  %v1215_v1 = vld [vmem:[#allocation2 + $0xc] sm:$0xf] }
  0xe7   : >> { %v923_v19 = vsel %vm695_vm10, %v918_v29, %v922_v30  ;;  %v928_v42 = vshll.u32 %v2045_v36, 16  ;;  %v926_v49 = vor.u32 %v924_v41, %v922_v30  ;;  %v1335_v30 = vshrl.u32 %v1986_v21, 16 }
  0xe8   : >> { %1290 = vmatpush.bf16.msra.mxu2 %v1990_v32  ;;  %v712_v32 = vsel %vm695_vm10, %v708_v26, %v711_v27  ;;  %v1118_v26 = vshrl.u32 %v2391_v57, 16  ;;  %v1338_v31 = vshll.u32 %v1986_v21, 16  ;;  %v1130_v61 = vshll.u32 %v2420_v25, 16 }
  0xe9   : >> { %1400 = vmatpush.bf16.msra.mxu3 %v1992_v33  ;;  %v826_v33 = vsel %vm821_vm11, %v823_v62, %v825_v28  ;;  %v930_v51 = vrot.slane %v928_v42, 1  ;;  %v1027_v62 = vunpack.c.l.b16 %v1004_v59  ;;  %v1337_v39 = vrot.slane %v1335_v30, 1 }
  0xea   : >> { %1183 = vmatpush.bf16.msra.mxu1 %v1985_v46  ;;  %1484 = vmatpush.bf16.msra.mxu0 %v1994_v47  ;;  %v715_v46 = vor.u32 %v713_v37, %v711_v27  ;;  %v718_v47 = vrot.slane %v716_v38, 1  ;;  %v1121_v27 = vshll.u32 %v2391_v57, 16  ;;  %v1340_v41 = vrot.slane %v1338_v31, 2 }
  0xeb   : >> { %v931_v20 = vsel %vm695_vm10, %v926_v49, %v930_v51  ;;  %v2444_v63 = vpack.c.b16 %v1027_v62, %v1027_v62  ;;  %v1127_v59 = vshrl.u32 %v2420_v25, 16  ;;  %v1344_v62 = vshrl.u32 %v1987_v58, 16 }
  0xec   : >> { %1291 = vmatpush.bf16.msra.mxu2 %v1989_v10  ;;  %v719_v53 = vsel %vm695_vm10, %v715_v46, %v718_v47  ;;  %v1238_v10 = vunpack.c.l.b16 %v1215_v1  ;;  %v1341_v49 = vor.u32 %v1340_v41, %v1337_v39  ;;  %v1132_v1 = vrot.slane %v1130_v61, 2  ;;  %v1432_v39 = vld [vmem:[#allocation2 + $0x28] sm:$0x3] }
  0xed   : >> { %1401 = vmatpush.bf16.msra.mxu3 %v1991_v11  ;;  %v1040_v11 = vrot.slane %v2444_v63, 1  ;;  %v1136_v25 = vshrl.u32 %v2433_v45, 16  ;;  %v1145_v41 = vshrl.u32 %v2444_v63, 16 }
  0xee   : >> { %1184 = vmatpush.bf16.msra.mxu1 %v1984_v12  ;;  %1485 = vmatpush.bf16.msra.mxu0 %v1993_v14 }
  0xef   : >> { %1801 = vmatmul.msk.bf16.vlgmr.msrb.gmra.mxu1 %vm640_vm9, %v705_v2  ;;  %1817 = vmatmul.msk.bf16.vlgmr.msrb.gmra.mxu2 %vm640_vm9, %v824_v4  ;;  %v720_v2 = vshrl.u32 %v2351_v23, 16  ;;  %v829_v4 = vrot.slane %v820_v44, 1  ;;  %v1041_v18 = vsel %vm821_vm11, %v1038_v52, %v1040_v11  ;;  %v1110_v23 = vshrl.u32 %v2393_v43, 16 }
  0xf0   : >> { %1833 = vmatmul.msk.bf16.vlgmr.msrb.gmra.mxu3 %vm640_vm9, %v915_v7  ;;  %v932_v7 = vshrl.u32 %v2045_v36, 16  ;;  %v1123_v36 = vrot.slane %v1121_v27, 2  ;;  %v1446_v52 = vrot.slane %v1986_v21, 2  ;;  %v1347_v44 = vshll.u32 %v1987_v58, 16 }
  0xf1   : >> { %1865 = vmatmul.msk.bf16.vlgmr.msrb.gmra.mxu0 %vm640_vm9, %v1035_v9  ;;  %v1237_v9 = vunpack.c.l.b16 %v1214_v0  ;;  %v722_v12 = vor.u32 %v720_v2, %v718_v47  ;;  %v830_v13 = vsel %vm821_vm11, %v827_v48, %v829_v4  ;;  %v1252_v48 = vrot.slane %v1986_v21, 1 }
  0xf2   : >> { %v934_v14 = vor.u32 %v932_v7, %v930_v51  ;;  %v1129_v0 = vrot.slane %v1127_v59, 1  ;;  %v1346_v2 = vrot.slane %v1344_v62, 1  ;;  %v1349_v4 = vrot.slane %v1347_v44, 2 }
  0xf3   : >> { %v1246_v17 = vpack.c.b16 %v1238_v10, %v1237_v9  ;;  %v1254_v9 = vrot.slane %v1987_v58, 1  ;;  %v1448_v11 = vrot.slane %v1987_v58, 2  ;;  %v1139_v21 = vshll.u32 %v2433_v45, 16 }
  0xf4   : >> { %v1133_v7 = vor.u32 %v1132_v1, %v1129_v0 }
  0xf5   : >> { %v1327_v28 = vshrl.u32 %v1246_v17, 16  ;;  %v1330_v29 = vshll.u32 %v1246_v17, 16  ;;  %v1251_v47 = vrot.slane %v1246_v17, 1  ;;  %v1449_v17 = vsel %vm1444_vm13, %v1446_v52, %v1448_v11 }
  0xf7   : >> { %v1329_v37 = vrot.slane %v1327_v28, 1  ;;  %v1332_v38 = vrot.slane %v1330_v29, 2  ;;  %v1222_v29 = vld [vmem:[#allocation2 + $0x28] sm:$0x1] }
  0xf9   : >> { %v1333_v57 = vor.u32 %v1332_v38, %v1329_v37 }
  0xff   : >> { %1802 = vmatmul.msk.bf16.gmra.mxu1 %vm640_vm9, %v712_v32  ;;  %1818 = vmatmul.msk.bf16.gmra.mxu2 %vm640_vm9, %v826_v33  ;;  %v1440_v32 = vunpack.c.l.b16 %v1431_v22  ;;  %v1112_v33 = vrot.slane %v1110_v23, 1 }
 0x100   : >> { %1834 = vmatmul.msk.bf16.gmra.mxu3 %vm640_vm9, %v923_v19  ;;  %v1115_v19 = vrot.slane %v1113_v24, 2  ;;  %v1138_v24 = vrot.slane %v1136_v25, 1 }
 0x101   : >> { %1866 = vmatmul.msk.bf16.gmra.mxu0 %vm640_vm9, %v1037_v34  ;;  %v1120_v34 = vrot.slane %v1118_v26, 1  ;;  %v1442_v42 = vpack.c.b16 %v1238_v10, %v1440_v32  ;;  %v1350_v10 = vor.u32 %v1349_v4, %v1346_v2  ;;  %v1141_v26 = vrot.slane %v1139_v21, 2 }
 0x102   : >> { %v1116_v43 = vor.u32 %v1115_v19, %v1112_v33  ;;  %v1245_v19 = vunpack.c.l.b16 %v1222_v29 }
 0x103   : >> { %v1124_v46 = vor.u32 %v1123_v36, %v1120_v34  ;;  %v1445_v51 = vrot.slane %v1442_v42, 2  ;;  %v1142_v30 = vor.u32 %v1141_v26, %v1138_v24  ;;  %v1148_v42 = vshll.u32 %v2444_v63, 16 }
 0x104   : >> { %v1250_v38 = vpack.c.b16 %v1245_v19, %v1245_v19 }
 0x105   : >> { %v1143_v34 = vsel %vm1108_vm12, %v1133_v7, %v1142_v30 }
 0x10f   : >> { %1803 = vmatmul.msk.bf16.gmra.mxu1 %vm640_vm9, %v719_v53  ;;  %1819 = vmatmul.msk.bf16.gmra.mxu2 %vm640_vm9, %v828_v54  ;;  %v1125_v53 = vsel %vm1108_vm12, %v1116_v43, %v1124_v46  ;;  %v1253_v54 = vsel %vm821_vm11, %v1251_v47, %v1252_v48  ;;  %v1362_v43 = vshrl.u32 %v1250_v38, 16  ;;  %v1441_v47 = vunpack.c.l.b16 %v1432_v39 }
 0x110   : >> { %1835 = vmatmul.msk.bf16.gmra.mxu3 %vm640_vm9, %v931_v20  ;;  %v1342_v20 = vsel %vm1108_vm12, %v1333_v57, %v1341_v49  ;;  %v1150_v57 = vrot.slane %v1148_v42, 2 }
 0x111   : >> { %1867 = vmatmul.msk.bf16.gmra.mxu0 %vm640_vm9, %v1039_v56  ;;  %v1447_v56 = vsel %vm1444_vm13, %v1445_v51, %v1446_v52  ;;  %v1443_v52 = vpack.c.b16 %v1441_v47, %v1441_v47 }
 0x11f   : >> { %1804 = vmatmul.msk.bf16.gmra.mxu1 %vm640_vm9, %v722_v12  ;;  %1820 = vmatmul.msk.bf16.gmra.mxu2 %vm640_vm9, %v830_v13  ;;  %v1134_v12 = vsel %vm1108_vm12, %v1124_v46, %v1133_v7  ;;  %v1255_v13 = vsel %vm821_vm11, %v1252_v48, %v1254_v9  ;;  %v1365_v46 = vshll.u32 %v1250_v38, 16  ;;  %v1147_v48 = vrot.slane %v1145_v41, 1 }
 0x120   : >> { %1836 = vmatmul.msk.bf16.gmra.mxu3 %vm640_vm9, %v934_v14  ;;  %v1351_v14 = vsel %vm1108_vm12, %v1341_v49, %v1350_v10  ;;  %v1364_v49 = vrot.slane %v1362_v43, 1 }
 0x121   : >> { %1868 = vmatmul.msk.bf16.gmra.mxu0 %vm640_vm9, %v1041_v18  ;;  %v1988_v18 = vld [vmem:[#allocation2 + $0x20] sm:$0xff]  ;;  %v1367_v51 = vrot.slane %v1365_v46, 2 }
 0x122   : >> { %v1353_v22 = vshrl.u32 %v1988_v18, 16  ;;  %v1356_v23 = vshll.u32 %v1988_v18, 16  ;;  %v1256_v31 = vrot.slane %v1988_v18, 1  ;;  %v1450_v33 = vrot.slane %v1988_v18, 2 }
 0x124   : >> { %v1355_v27 = vrot.slane %v1353_v22, 1  ;;  %v1358_v28 = vrot.slane %v1356_v23, 2  ;;  %v1257_v36 = vsel %vm821_vm11, %v1254_v9, %v1256_v31  ;;  %v1451_v45 = vsel %vm1444_vm13, %v1448_v11, %v1450_v33 }
 0x126   : >> { %v1359_v32 = vor.u32 %v1358_v28, %v1355_v27 }
 0x128   : >> { %v1360_v37 = vsel %vm1108_vm12, %v1350_v10, %v1359_v32 }
 0x12f   : >> { %1881 = vmatmul.msk.bf16.vlgmr.msra.gmra.mxu1 %vm640_vm9, %v1125_v53  ;;  %1909 = vmatmul.msk.bf16.vlgmr.msra.gmra.mxu2 %vm640_vm9, %v1253_v54  ;;  %v1151_v53 = vor.u32 %v1150_v57, %v1147_v48  ;;  %v1258_v54 = vrot.slane %v1250_v38, 1 }
 0x130   : >> { %1925 = vmatmul.msk.bf16.vlgmr.msra.gmra.mxu3 %vm640_vm9, %v1342_v20  ;;  %v1368_v20 = vor.u32 %v1367_v51, %v1364_v49 }
 0x131   : >> { %1941 = vmatmul.msk.bf16.vlgmr.msra.gmra.mxu0 %vm640_vm9, %v1447_v56  ;;  %v1452_v56 = vrot.slane %v1443_v52, 2  ;;  %v1152_v59 = vsel %vm1108_vm12, %v1142_v30, %v1151_v53  ;;  %v1259_v61 = vsel %vm821_vm11, %v1256_v31, %v1258_v54 }
 0x132   : >> { %v1369_v63 = vsel %vm1108_vm12, %v1359_v32, %v1368_v20 }
 0x133   : >> { %v1453_v44 = vsel %vm1444_vm13, %v1450_v33, %v1452_v56 }
 0x13f   : >> { %1882 = vmatmul.msk.bf16.gmra.mxu1 %vm640_vm9, %v1134_v12  ;;  %1910 = vmatmul.msk.bf16.gmra.mxu2 %vm640_vm9, %v1255_v13 }
 0x140   : >> { %1926 = vmatmul.msk.bf16.gmra.mxu3 %vm640_vm9, %v1351_v14 }
 0x141   : >> { %1942 = vmatmul.msk.bf16.gmra.mxu0 %vm640_vm9, %v1449_v17 }
 0x14f   : >> { %1883 = vmatmul.msk.bf16.gmra.mxu1 %vm640_vm9, %v1143_v34  ;;  %1911 = vmatmul.msk.bf16.gmra.mxu2 %vm640_vm9, %v1257_v36 }
 0x150   : >> { %1927 = vmatmul.msk.bf16.gmra.mxu3 %vm640_vm9, %v1360_v37 }
 0x151   : >> { %1943 = vmatmul.msk.bf16.gmra.mxu0 %vm640_vm9, %v1451_v45 }
 0x15c   : >> { %v667_v58 = vpop.f32.mrf.mxu1 }
 0x15e   : >> { %v662_v62 = vpop.f32.mrf.mxu0 }
 0x15f   : >> { %1884 = vmatmul.msk.bf16.gmra.mxu1 %vm640_vm9, %v1152_v59  ;;  %1912 = vmatmul.msk.bf16.gmra.mxu2 %vm640_vm9, %v1259_v61  ;;  %v682_v41 = vadd.f32 %v2271_v5, %v662_v62 }
 0x160   : >> { %1928 = vmatmul.msk.bf16.gmra.mxu3 %vm640_vm9, %v1369_v63  ;;  %v684_v63 = vadd.f32 %v2271_v5, %v667_v58 }
 0x161   : >> { %1944 = vmatmul.msk.bf16.gmra.mxu0 %vm640_vm9, %v1453_v44 }
 0x162   : >> { %v2496_v0 = vpop.f32.mrf.mxu2 }
 0x163   : >> { %v2498_v1 = vpop.f32.mrf.mxu3 }
 0x164   : >> { %v669_v2 = vpop.f32.mrf.mxu1 }
 0x166   : >> { %v664_v4 = vpop.f32.mrf.mxu0 }
 0x167   : >> { %v683_v49 = vadd.f32 %v2271_v5, %v664_v4 }
 0x16a   : >> { %v2500_v7 = vpop.f32.mrf.mxu2 }
 0x16b   : >> { %v2502_v9 = vpop.f32.mrf.mxu3 }
 0x16c   : >> { %v756_v10 = vpop.f32.mrf.mxu1 }
 0x16d   : >> { %v776_v46 = vadd.f32 %v756_v10, %v682_v41 }
 0x16e   : >> { %v1075_v11 = vpop.f32.mrf.mxu0 }
 0x172   : >> { %v864_v12 = vpop.f32.mrf.mxu2 }
 0x173   : >> { %v968_v13 = vpop.f32.mrf.mxu3  ;;  %v884_v48 = vadd.f32 %v864_v12, %v776_v46 }
 0x174   : >> { %v758_v14 = vpop.f32.mrf.mxu1 }
 0x175   : >> { %v988_v51 = vadd.f32 %v968_v13, %v884_v48  ;;  %v777_v54 = vadd.f32 %v758_v14, %v683_v49 }
 0x176   : >> { %v1077_v17 = vpop.f32.mrf.mxu0 }
 0x177   : >> { %v1095_v59 = vadd.f32 %v1075_v11, %v988_v51 }
 0x17a   : >> { %v866_v18 = vpop.f32.mrf.mxu2 }
 0x17b   : >> { %v970_v25 = vpop.f32.mrf.mxu3  ;;  %v885_v56 = vadd.f32 %v866_v18, %v777_v54  ;;  %v685_v18 = vadd.f32 %v2271_v5, %v669_v2  ;;  %v686_v2 = vadd.f32 %v2271_v5, %v2496_v0 }
 0x17c   : >> { %v761_v21 = vpop.f32.mrf.mxu1 }
 0x17d   : >> { %v989_v44 = vadd.f32 %v970_v25, %v885_v56  ;;  %v778_v46 = vadd.f32 %v761_v21, %v684_v63 }
 0x17e   : >> { %v1080_v22 = vpop.f32.mrf.mxu0 }
 0x17f   : >> { %v1096_v48 = vadd.f32 %v1077_v17, %v989_v44 }
 0x182   : >> { %v869_v23 = vpop.f32.mrf.mxu2 }
 0x183   : >> { %v973_v24 = vpop.f32.mrf.mxu3  ;;  %v886_v4 = vadd.f32 %v869_v23, %v778_v46 }
 0x184   : >> { %v763_v26 = vpop.f32.mrf.mxu1 }
 0x185   : >> { %v990_v11 = vadd.f32 %v973_v24, %v886_v4 }
 0x186   : >> { %v2504_v27 = vpop.f32.mrf.mxu0 }
 0x18a   : >> { %v871_v28 = vpop.f32.mrf.mxu2 }
 0x18b   : >> { %v975_v29 = vpop.f32.mrf.mxu3 }
 0x18c   : >> { %v2506_v30 = vpop.f32.mrf.mxu1 }
 0x18d   : >> { %v780_v63 = vadd.f32 %v2506_v30, %v686_v2 }
 0x18e   : >> { %v2508_v31 = vpop.f32.mrf.mxu0 }
 0x192   : >> { %v2510_v32 = vpop.f32.mrf.mxu2 }
 0x193   : >> { %v2512_v33 = vpop.f32.mrf.mxu3 }
 0x194   : >> { %v2514_v19 = vpop.f32.mrf.mxu1 }
 0x196   : >> { %v2516_v34 = vpop.f32.mrf.mxu0 }
 0x19a   : >> { %v2518_v36 = vpop.f32.mrf.mxu2 }
 0x19b   : >> { %v2520_v37 = vpop.f32.mrf.mxu3 }
 0x19c   : >> { %v2522_v45 = vpop.f32.mrf.mxu1 }
 0x19e   : >> { %v2524_v38 = vpop.f32.mrf.mxu0 }
 0x1a2   : >> { %v2526_v39 = vpop.f32.mrf.mxu2 }
 0x1a3   : >> { %v2529_v42 = vpop.f32.mrf.mxu3 }
 0x1a4   : >> { %v2531_v43 = vpop.f32.mrf.mxu1 }
 0x1a6   : >> { %v2533_v47 = vpop.f32.mrf.mxu0 }
 0x1a7   : >> { %2639 = vst [vmem:[#allocation6_spill] sm:$0xff] %v2533_v47 }
 0x1aa   : >> { %v2535_v57 = vpop.f32.mrf.mxu2 }
 0x1ab   : >> { %v2538_v52 = vpop.f32.mrf.mxu3 }
 0x1ac   : >> { %v1186_v53 = vpop.f32.mrf.mxu1 }
 0x1ad   : >> { %v1206_v61 = vadd.f32 %v1186_v53, %v1095_v59  ;;  %v779_v53 = vadd.f32 %v763_v26, %v685_v18 }
 0x1ae   : >> { %v1487_v20 = vpop.f32.mrf.mxu0 }
 0x1af   : >> { %v887_v59 = vadd.f32 %v871_v28, %v779_v53 }
 0x1b2   : >> { %v1293_v62 = vpop.f32.mrf.mxu2 }
 0x1b3   : >> { %v1313_v10 = vadd.f32 %v1293_v62, %v1206_v61  ;;  %v1403_v41 = vpop.f32.mrf.mxu3 }
 0x1b4   : >> { %v1188_v12 = vpop.f32.mrf.mxu1 }
 0x1b5   : >> { %v1423_v6 = vadd.f32 %v1403_v41, %v1313_v10  ;;  %v1207_v47 = vadd.f32 %v1188_v12, %v1096_v48 }
 0x1b6   : >> { %v1489_v60 = vpop.f32.mrf.mxu0 }
 0x1b7   : >> { %v1507_v13 = vadd.f32 %v1487_v20, %v1423_v6  ;;  %v1097_v6 = vadd.f32 %v1080_v22, %v990_v11 }
 0x1b9   : >> { %v1515_v40 = vmax.f32 %v1507_v13, 0.0 }
 0x1ba   : >> { %v1295_v14 = vpop.f32.mrf.mxu2 }
 0x1bb   : >> { %v1523_v49 = vmul.f32 %v1515_v40, %v2257_v50  ;;  %v1314_v51 = vadd.f32 %v1295_v14, %v1207_v47  ;;  %v1405_v58 = vpop.f32.mrf.mxu3  ;;  %v991_v40 = vadd.f32 %v975_v29, %v887_v59  ;;  %v687_v14 = vadd.f32 %v2271_v5, %v2500_v7 }
 0x1bc   : >> { %v1191_v25 = vpop.f32.mrf.mxu1 }
 0x1bd   : >> { %v1531_v54 = vpack.c.bf16 %v1523_v49, %v1523_v49  ;;  %v1424_v56 = vadd.f32 %v1405_v58, %v1314_v51  ;;  %v1208_v20 = vadd.f32 %v1191_v25, %v1097_v6  ;;  %v1098_v4 = vadd.f32 %v2504_v27, %v991_v40 }
 0x1be   : >> { %v1492_v21 = vpop.f32.mrf.mxu0  ;;  %v781_v27 = vadd.f32 %v2514_v19, %v687_v14 }
 0x1bf   : >> { %v1547_v61 = vrot.slane %v1531_v54, 7  ;;  %v1508_v23 = vadd.f32 %v1489_v60, %v1424_v56  ;;  %v888_v60 = vadd.f32 %v2510_v32, %v780_v63 }
 0x1c0   : >> { %v889_v53 = vadd.f32 %v2518_v36, %v781_v27 }
 0x1c1   : >> { %1579 = vst.msk [vmem:[#allocation2 + $0x4] sm:$0xe] %vm571_vm2, %v1547_v61  ;;  %v1516_v17 = vmax.f32 %v1508_v23, 0.0  ;;  %v1548_v41 = vrot.slane %v1547_v61, 4  ;;  %v992_v48 = vadd.f32 %v2512_v33, %v888_v60  ;;  %v688_v23 = vadd.f32 %v2271_v5, %v2498_v1 }
 0x1c2   : >> { %v1298_v24 = vpop.f32.mrf.mxu2  ;;  %v993_v6 = vadd.f32 %v2520_v37, %v889_v53 }
 0x1c3   : >> { %v1524_v47 = vmul.f32 %v1516_v17, %v2266_v3  ;;  %v1315_v62 = vadd.f32 %v1298_v24, %v1208_v20  ;;  %v1408_v26 = vpop.f32.mrf.mxu3  ;;  %v1099_v25 = vadd.f32 %v2508_v31, %v992_v48  ;;  %v782_v20 = vadd.f32 %v2522_v45, %v688_v23 }
 0x1c4   : >> { %v1193_v44 = vpop.f32.mrf.mxu1  ;;  %v1100_v1 = vadd.f32 %v2516_v34, %v993_v6 }
 0x1c5   : >> { %v1532_v28 = vpack.c.bf16 %v1524_v47, %v1524_v47  ;;  %v1425_v10 = vadd.f32 %v1408_v26, %v1315_v62  ;;  %v1209_v13 = vadd.f32 %v1193_v44, %v1098_v4  ;;  %v890_v47 = vadd.f32 %v2526_v39, %v782_v20 }
 0x1c6   : >> { %v1494_v22 = vpop.f32.mrf.mxu0 }
 0x1c7   : >> { %v1549_v12 = vrot.slane %v1532_v28, 7  ;;  %v1509_v46 = vadd.f32 %v1492_v21, %v1425_v10  ;;  %v994_v10 = vadd.f32 %v2529_v42, %v890_v47 }
 0x1c9   : >> { %v1550_v0 = vsel %vm2278_vm5, %v1548_v41, %v1549_v12  ;;  %v1517_v29 = vmax.f32 %v1509_v46, 0.0  ;;  %v1551_v33 = vrot.slane %v1549_v12, 4 }
 0x1ca   : >> { %1580 = vst.msk [vmem:[#allocation2 + $0x8] sm:$0xf] %vm261_vm1, %v1550_v0  ;;  %v1300_v30 = vpop.f32.mrf.mxu2 }
 0x1cb   : >> { %v1525_v32 = vmul.f32 %v1517_v29, %v2275_v8  ;;  %v1316_v18 = vadd.f32 %v1300_v30, %v1209_v13  ;;  %v1410_v11 = vpop.f32.mrf.mxu3  ;;  %v1101_v29 = vadd.f32 %v2524_v38, %v994_v10 }
 0x1cc   : >> { %v1196_v49 = vpop.f32.mrf.mxu1 }
 0x1cd   : >> { %v1533_v51 = vpack.c.bf16 %v1525_v32, %v1525_v32  ;;  %v1426_v58 = vadd.f32 %v1410_v11, %v1316_v18  ;;  %v1210_v61 = vadd.f32 %v1196_v49, %v1099_v25 }
 0x1ce   : >> { %v1497_v21 = vpop.f32.mrf.mxu0 }
 0x1cf   : >> { %v1552_v54 = vrot.slane %v1533_v51, 7  ;;  %v1510_v56 = vadd.f32 %v1494_v22, %v1426_v58  ;;  %v689_v22 = vadd.f32 %v2271_v5, %v2502_v9 }
 0x1d1   : >> { %v1553_v7 = vsel %vm2278_vm5, %v1551_v33, %v1552_v54  ;;  %v1518_v59 = vmax.f32 %v1510_v56, 0.0  ;;  %v1554_v62 = vrot.slane %v1552_v54, 4  ;;  %v783_v34 = vadd.f32 %v2531_v43, %v689_v22  ;;  %v2640_v54 = vld [vmem:[#allocation6_spill] sm:$0xff] }
 0x1d2   : >> { %1581 = vst.msk [vmem:[#allocation2 + $0xc] sm:$0xf] %vm261_vm1, %v1553_v7  ;;  %v1303_v19 = vpop.f32.mrf.mxu2  ;;  %v1590_v22 = vld [vmem:[#allocation2 + $0x4] sm:$0xe] (%p592_p4) }
 0x1d3   : >> { %v1526_v31 = vmul.f32 %v1518_v59, %v2291_v35  ;;  %v1317_v36 = vadd.f32 %v1303_v19, %v1210_v61  ;;  %v1413_v17 = vpop.f32.mrf.mxu3  ;;  %v891_v42 = vadd.f32 %v2535_v57, %v783_v34  ;;  %v2641_v61 = vld [vmem:[#allocation3_spill] sm:$0xff] }
 0x1d4   : >> { %v1198_v2 = vpop.f32.mrf.mxu1 }
 0x1d5   : >> { %v1534_v24 = vpack.c.bf16 %v1526_v31, %v1526_v31  ;;  %v1427_v40 = vadd.f32 %v1413_v17, %v1317_v36  ;;  %v1211_v28 = vadd.f32 %v1198_v2, %v1100_v1  ;;  %v995_v11 = vadd.f32 %v2538_v52, %v891_v42 }
 0x1d6   : >> { %v1499_v45 = vpop.f32.mrf.mxu0 }
 0x1d7   : >> { %v1555_v26 = vrot.slane %v1534_v24, 7  ;;  %v1511_v63 = vadd.f32 %v1497_v21, %v1427_v40  ;;  %v1102_v56 = vadd.f32 %v2640_v54, %v995_v11 }
 0x1d9   : >> { %v1556_v44 = vsel %vm2278_vm5, %v1554_v62, %v1555_v26  ;;  %v1519_v37 = vmax.f32 %v1511_v63, 0.0  ;;  %v1557_v13 = vrot.slane %v1555_v26, 4  ;;  %v2642_v62 = vld [vmem:[#allocation4_spill] sm:$0xff] }
 0x1da   : >> { %1582 = vst.msk [vmem:[#allocation2 + $0x10] sm:$0xf] %vm261_vm1, %v1556_v44  ;;  %v1305_v60 = vpop.f32.mrf.mxu2 }
 0x1db   : >> { %v1527_v39 = vmul.f32 %v1519_v37, %v2261_v55  ;;  %v1318_v41 = vadd.f32 %v1305_v60, %v1211_v28  ;;  %v1415_v12 = vpop.f32.mrf.mxu3  ;;  %v1587_v37 = vld [vmem:[#allocation2 + $0x24] sm:$0x1] }
 0x1dc   : >> { %v1201_v46 = vpop.f32.mrf.mxu1 }
 0x1dd   : >> { %v1535_v4 = vpack.c.bf16 %v1527_v39, %v1527_v39  ;;  %v1428_v0 = vadd.f32 %v1415_v12, %v1318_v41  ;;  %v1212_v32 = vadd.f32 %v1201_v46, %v1101_v29  ;;  %v2037_v39 = vld [vmem:[#allocation2 + $0x8] sm:$0xff] (%p592_p4)   ;;  %v1599_v12 = vunpack.c.l.bf16 (%p592_p4), %v1590_v22 }
 0x1de   : >> { %v1502_v38 = vpop.f32.mrf.mxu0  ;;  %v2009_v46 = vunpack.c.l.bf16 (%p592_p4), %v2037_v39  ;;  %v2010_v34 = vunpack.c.h.bf16 (%p592_p4), %v2037_v39 }
 0x1df   : >> { %v1558_v48 = vrot.slane %v1535_v4, 7  ;;  %v1512_v30 = vadd.f32 %v1499_v45, %v1428_v0  ;;  %1609 = vst.msk [vmem:[%s2160_s11 - $0x2] sm:$0xfc] (%p592_p4), %vm1608_vm14, %v1599_v12 }
 0x1e0   : > { %1611 = vst.msk [vmem:[%s2160_s11 + $0x6] sm:$0xff] (%p592_p4), %vm640_vm9, %v2009_v46 }
 0x1e1   : >> { %v1559_v14 = vsel %vm2278_vm5, %v1557_v13, %v1558_v48  ;;  %v1520_v9 = vmax.f32 %v1512_v30, 0.0  ;;  %v1560_v25 = vrot.slane %v1558_v48, 4  ;;  %1612 = vst.msk [vmem:[%s2160_s11 + $0xe] sm:$0xff] (%p592_p4), %vm640_vm9, %v2010_v34 }
 0x1e2   : >> { %1583 = vst.msk [vmem:[#allocation2 + $0x14] sm:$0xf] %vm261_vm1, %v1559_v14  ;;  %v1308_v18 = vpop.f32.mrf.mxu2 }
 0x1e3   : >> { %v1528_v43 = vmul.f32 %v1520_v9, %v2282_v16  ;;  %v1319_v49 = vadd.f32 %v1308_v18, %v1212_v32  ;;  %v1418_v27 = vpop.f32.mrf.mxu3 }
 0x1e4   : >> { %v1203_v58 = vpop.f32.mrf.mxu1 }
 0x1e5   : >> { %v1536_v51 = vpack.c.bf16 %v1528_v43, %v1528_v43  ;;  %v1429_v57 = vadd.f32 %v1418_v27, %v1319_v49  ;;  %v1213_v59 = vadd.f32 %v1203_v58, %v1102_v56 }
 0x1e6   : >> { %v1504_v17 = vpop.f32.mrf.mxu0 }
 0x1e7   : >> { %v1561_v53 = vrot.slane %v1536_v51, 7  ;;  %v1513_v33 = vadd.f32 %v1502_v38, %v1429_v57 }
 0x1e9   : >> { %v1562_v21 = vsel %vm2278_vm5, %v1560_v25, %v1561_v53  ;;  %v1521_v7 = vmax.f32 %v1513_v33, 0.0  ;;  %v1563_v20 = vrot.slane %v1561_v53, 4  ;;  %v2038_v41 = vld [vmem:[#allocation2 + $0x10] sm:$0xff] (%p592_p4)  }
 0x1ea   : >> { %1584 = vst.msk [vmem:[#allocation2 + $0x18] sm:$0xf] %vm261_vm1, %v1562_v21  ;;  %v1310_v52 = vpop.f32.mrf.mxu2  ;;  %v2013_v0 = vunpack.c.l.bf16 (%p592_p4), %v2038_v41  ;;  %v2014_v29 = vunpack.c.h.bf16 (%p592_p4), %v2038_v41 }
 0x1eb   : >> { %v1529_v23 = vmul.f32 %v1521_v7, %v2641_v61  ;;  %v1320_v19 = vadd.f32 %v1310_v52, %v1213_v59  ;;  %v1420_v6 = vpop.f32.mrf.mxu3 }
 0x1ec   : > { %1613 = vst.msk [vmem:[%s2160_s11 + $0x16] sm:$0xff] (%p592_p4), %vm640_vm9, %v2013_v0 }
 0x1ed   : >> { %v1537_v31 = vpack.c.bf16 %v1529_v23, %v1529_v23  ;;  %v1430_v36 = vadd.f32 %v1420_v6, %v1320_v19  ;;  %1614 = vst.msk [vmem:[%s2160_s11 + $0x1e] sm:$0xff] (%p592_p4), %vm640_vm9, %v2014_v29 }
 0x1ef   : >> { %v1564_v2 = vrot.slane %v1537_v31, 7  ;;  %v1514_v24 = vadd.f32 %v1504_v17, %v1430_v36 }
 0x1f1   : >> { %v1565_v40 = vsel %vm2278_vm5, %v1563_v20, %v1564_v2  ;;  %v1522_v47 = vmax.f32 %v1514_v24, 0.0  ;;  %v1566_v1 = vrot.slane %v1564_v2, 4 }
 0x1f2   : >> { %1585 = vst.msk [vmem:[#allocation2 + $0x1c] sm:$0xf] %vm261_vm1, %v1565_v40 }
 0x1f3   : >> { %v1530_v26 = vmul.f32 %v1522_v47, %v2642_v62 }
 0x1f5   : >> { %v1538_v63 = vpack.c.bf16 %v1530_v26, %v1530_v26 }
 0x1f7   : >> { %v1567_v44 = vrot.slane %v1538_v63, 7 }
 0x1f8   : > { %594 = sbr.rel (!%p592_p4) target bundleno = 215 (0xd7), region = 89 }
 0x1f9   : >> { %v1568_v28 = vsel %vm2278_vm5, %v1566_v1, %v1567_v44  ;;  %v1569_v10 = vrot.slane %v1567_v44, 4  ;;  %v2039_v4 = vld [vmem:[#allocation2 + $0x18] sm:$0xff] (%p592_p4)  }
 0x1fa   : >> { %1586 = vst.msk [vmem:[#allocation2 + $0x20] sm:$0xf] %vm261_vm1, %v1568_v28  ;;  %v2017_v55 = vunpack.c.l.bf16 (%p592_p4), %v2039_v4  ;;  %v2018_v5 = vunpack.c.h.bf16 (%p592_p4), %v2039_v4 }
 0x1fb   : >> { %v1588_v60 = vsel %vm2318_vm8, %v1569_v10, %v1587_v37 }
 0x1fc   : >> { %1589 = vst [vmem:[#allocation2 + $0x24] sm:$0x1] %v1588_v60 }
 0x1fd   : > { %1615 = vst.msk [vmem:[%s2160_s11 + $0x26] sm:$0xff] %vm640_vm9, %v2017_v55 }
 0x1fe   : > { %1616 = vst.msk [vmem:[%s2160_s11 + $0x2e] sm:$0xff] %vm640_vm9, %v2018_v5 }
 0x201   : > { %v1597_v50 = vld [vmem:[#allocation2 + $0x20] sm:$0xf] }
 0x202   : > { %v1606_v8 = vunpack.c.l.bf16 %v1597_v50 }
 0x203   : > { %v1598_v3 = vld [vmem:[#allocation2 + $0x24] sm:$0x1] }
 0x204   : > { %v1607_v15 = vunpack.c.l.bf16 %v1598_v3  ;;  %1617 = vst.msk [vmem:[%s2160_s11 + $0x36] sm:$0xff] %vm640_vm9, %v1606_v8 }
 0x206   : > { %1619 = vst.msk [vmem:[%s2160_s11 + $0x3e] sm:$0x1] %vm580_vm6, %v1607_v15 }
 0x207 PF: > { %s16_s21 = sadd.s32 1, %s2093_s21  }
 0x208   : > { %p13_p5 = scmp.ge.s32.totalorder %s16_s21, 4  }
 0x20a   :  { %15 = sbr.rel (!%p13_p5) target bundleno = 1 (0x1), region = 100 }

// kernel: encoder_depth_forward.5
= control target key start
LH: loop header
LB: loop body
LE: loop exit
PB: predicated region body
PF: predicated region fallthrough
CT: control target
= control target key end

     0   :  { %vm855_vm0 = vcmask 261120   ;;  %vm1028_vm1 = vcmask 64512   ;;  %s1867_s1 = inlined_call_operand.vmem [shape: bf16[1568,8], index: 1, kind: input, shape index: {}]   ;;  %s1868_s2 = inlined_call_operand.vmem [shape: f32[1,8], index: 2, kind: input, shape index: {}]   ;;  %s1869_s0 = inlined_call_operand.vmem [shape: bf16[8,1568], index: 0, kind: input, shape index: {}]   ;;  %s1870_s3 = inlined_call_operand.vmem [shape: f32[8,8], index: 3, kind: output, shape index: {}]  }
   0x1   :  { %v1434_v0 = vld [vmem:[%s1867_s1 + $0x38] sm:$0xff]  ;;  %v1433_v4 = vld [vmem:[%s1867_s1 + $0x30] sm:$0xff]  ;;  %v1432_v8 = vld [vmem:[%s1867_s1 + $0x28] sm:$0xff] }
   0x2   :  { %v1450_v1 = vld [vmem:[%s1867_s1 + $0xb8] sm:$0xff]  ;;  %859 = vmatpush.bf16.msra.mxu0 %v1434_v0  ;;  %v1449_v5 = vld [vmem:[%s1867_s1 + $0xb0] sm:$0xff]  ;;  %v1448_v9 = vld [vmem:[%s1867_s1 + $0xa8] sm:$0xff] }
   0x3   :  { %v1442_v2 = vld [vmem:[%s1867_s1 + $0x78] sm:$0xff]  ;;  %885 = vmatpush.bf16.msra.mxu2 %v1450_v1  ;;  %v1441_v6 = vld [vmem:[%s1867_s1 + $0x70] sm:$0xff]  ;;  %v1440_v10 = vld [vmem:[%s1867_s1 + $0x68] sm:$0xff] }
   0x4   :  { %v1458_v3 = vld [vmem:[%s1867_s1 + $0xf8] sm:$0xff]  ;;  %872 = vmatpush.bf16.msra.mxu1 %v1442_v2  ;;  %v1457_v7 = vld [vmem:[%s1867_s1 + $0xf0] sm:$0xff]  ;;  %v1456_v11 = vld [vmem:[%s1867_s1 + $0xe8] sm:$0xff] }
   0x5   :  { %898 = vmatpush.bf16.msra.mxu3 %v1458_v3  ;;  %v1431_v12 = vld [vmem:[%s1867_s1 + $0x20] sm:$0xff]  ;;  %v1430_v16 = vld [vmem:[%s1867_s1 + $0x18] sm:$0xff]  ;;  %v1429_v20 = vld [vmem:[%s1867_s1 + $0x10] sm:$0xff] }
   0x6   :  { %860 = vmatpush.bf16.msra.mxu0 %v1433_v4  ;;  %v1447_v13 = vld [vmem:[%s1867_s1 + $0xa0] sm:$0xff]  ;;  %v1446_v17 = vld [vmem:[%s1867_s1 + $0x98] sm:$0xff]  ;;  %v1445_v21 = vld [vmem:[%s1867_s1 + $0x90] sm:$0xff] }
   0x7   :  { %886 = vmatpush.bf16.msra.mxu2 %v1449_v5  ;;  %v1439_v14 = vld [vmem:[%s1867_s1 + $0x60] sm:$0xff]  ;;  %v1438_v18 = vld [vmem:[%s1867_s1 + $0x58] sm:$0xff]  ;;  %v1437_v22 = vld [vmem:[%s1867_s1 + $0x50] sm:$0xff] }
   0x8   :  { %873 = vmatpush.bf16.msra.mxu1 %v1441_v6  ;;  %v1455_v15 = vld [vmem:[%s1867_s1 + $0xe0] sm:$0xff]  ;;  %v1454_v19 = vld [vmem:[%s1867_s1 + $0xd8] sm:$0xff]  ;;  %v1453_v23 = vld [vmem:[%s1867_s1 + $0xd0] sm:$0xff] }
   0x9   :  { %899 = vmatpush.bf16.msra.mxu3 %v1457_v7  ;;  %v1428_v24 = vld [vmem:[%s1867_s1 + $0x8] sm:$0xff]  ;;  %v15_v29 = vld [vmem:[%s1869_s0] sm:$0xff]  ;;  %v1466_v34 = vld [vmem:[%s1867_s1 + $0x138] sm:$0xff] }
   0xa   :  { %861 = vmatpush.bf16.msra.mxu0 %v1432_v8  ;;  %v1444_v25 = vld [vmem:[%s1867_s1 + $0x88] sm:$0xff]  ;;  %v1427_v30 = vld [vmem:[%s1867_s1] sm:$0xff]  ;;  %v229_v33 = vunpack.c.l.b16 %v15_v29  ;;  %v1482_v35 = vld [vmem:[%s1867_s1 + $0x1b8] sm:$0xff]  ;;  %v230_v39 = vunpack.c.h.b16 %v15_v29 }
   0xb   :  { %887 = vmatpush.bf16.msra.mxu2 %v1448_v9  ;;  %v1436_v26 = vld [vmem:[%s1867_s1 + $0x48] sm:$0xff]  ;;  %v1443_v31 = vld [vmem:[%s1867_s1 + $0x80] sm:$0xff]  ;;  %v1474_v40 = vld [vmem:[%s1867_s1 + $0x178] sm:$0xff] }
   0xc   :  { %874 = vmatpush.bf16.msra.mxu1 %v1440_v10  ;;  %v1452_v27 = vld [vmem:[%s1867_s1 + $0xc8] sm:$0xff]  ;;  %v1435_v36 = vld [vmem:[%s1867_s1 + $0x40] sm:$0xff]  ;;  %v1490_v41 = vld [vmem:[%s1867_s1 + $0x1f8] sm:$0xff]  ;;  %v242_v43 = vpack.c.b16 %v229_v33, %v229_v33  ;;  %v243_v47 = vpack.c.b16 %v230_v39, %v230_v39 }
   0xd   :  { %900 = vmatpush.bf16.msra.mxu3 %v1456_v11  ;;  %v16_v28 = vld [vmem:[%s1869_s0 + $0x8] sm:$0xff]  ;;  %v1451_v37 = vld [vmem:[%s1867_s1 + $0xc0] sm:$0xff]  ;;  %v1465_v44 = vld [vmem:[%s1867_s1 + $0x130] sm:$0xff] }
   0xe   :  { %862 = vmatpush.bf16.msra.mxu0 %v1431_v12  ;;  %v231_v32 = vunpack.c.l.b16 %v16_v28  ;;  %v232_v38 = vunpack.c.h.b16 %v16_v28  ;;  %v1481_v45 = vld [vmem:[%s1867_s1 + $0x1b0] sm:$0xff]  ;;  %v1464_v50 = vld [vmem:[%s1867_s1 + $0x128] sm:$0xff]  ;;  %v1463_v54 = vld [vmem:[%s1867_s1 + $0x120] sm:$0xff] }
   0xf   :  { %888 = vmatpush.bf16.msra.mxu2 %v1447_v13  ;;  %v1473_v48 = vld [vmem:[%s1867_s1 + $0x170] sm:$0xff]  ;;  %v1480_v51 = vld [vmem:[%s1867_s1 + $0x1a8] sm:$0xff]  ;;  %v1479_v55 = vld [vmem:[%s1867_s1 + $0x1a0] sm:$0xff] }
  0x10   :  { %875 = vmatpush.bf16.msra.mxu1 %v1439_v14  ;;  %v244_v42 = vpack.c.b16 %v231_v32, %v231_v32  ;;  %v245_v46 = vpack.c.b16 %v232_v38, %v232_v38  ;;  %v1489_v49 = vld [vmem:[%s1867_s1 + $0x1f0] sm:$0xff]  ;;  %v1472_v52 = vld [vmem:[%s1867_s1 + $0x168] sm:$0xff]  ;;  %v1471_v56 = vld [vmem:[%s1867_s1 + $0x160] sm:$0xff] }
  0x11   :  { %901 = vmatpush.bf16.msra.mxu3 %v1455_v15  ;;  %v1488_v53 = vld [vmem:[%s1867_s1 + $0x1e8] sm:$0xff]  ;;  %v1487_v57 = vld [vmem:[%s1867_s1 + $0x1e0] sm:$0xff]  ;;  %v1462_v58 = vld [vmem:[%s1867_s1 + $0x118] sm:$0xff] }
  0x12   :  { %863 = vmatpush.bf16.msra.mxu0 %v1430_v16  ;;  %v1478_v59 = vld [vmem:[%s1867_s1 + $0x198] sm:$0xff]  ;;  %v1461_v62 = vld [vmem:[%s1867_s1 + $0x110] sm:$0xff]  ;;  %v1460_v2 = vld [vmem:[%s1867_s1 + $0x108] sm:$0xff] }
  0x13   :  { %889 = vmatpush.bf16.msra.mxu2 %v1446_v17  ;;  %v1470_v60 = vld [vmem:[%s1867_s1 + $0x158] sm:$0xff]  ;;  %v1477_v63 = vld [vmem:[%s1867_s1 + $0x190] sm:$0xff]  ;;  %v1476_v3 = vld [vmem:[%s1867_s1 + $0x188] sm:$0xff] }
  0x14   :  { %876 = vmatpush.bf16.msra.mxu1 %v1438_v18  ;;  %v1486_v61 = vld [vmem:[%s1867_s1 + $0x1d8] sm:$0xff]  ;;  %v1469_v0 = vld [vmem:[%s1867_s1 + $0x150] sm:$0xff]  ;;  %v1468_v6 = vld [vmem:[%s1867_s1 + $0x148] sm:$0xff] }
  0x15   :  { %902 = vmatpush.bf16.msra.mxu3 %v1454_v19  ;;  %v1485_v1 = vld [vmem:[%s1867_s1 + $0x1d0] sm:$0xff]  ;;  %v18_v4 = vld [vmem:[%s1869_s0 + $0x18] sm:$0xff]  ;;  %v1484_v7 = vld [vmem:[%s1867_s1 + $0x1c8] sm:$0xff] }
  0x16   :  { %864 = vmatpush.bf16.msra.mxu0 %v1429_v20  ;;  %v17_v5 = vld [vmem:[%s1869_s0 + $0x10] sm:$0xff]  ;;  %v1459_v8 = vld [vmem:[%s1867_s1 + $0x100] sm:$0xff]  ;;  %v235_v10 = vunpack.c.l.b16 %v18_v4  ;;  %v1498_v12 = vld [vmem:[%s1867_s1 + $0x238] sm:$0xff]  ;;  %v236_v16 = vunpack.c.h.b16 %v18_v4 }
  0x17   :  { %890 = vmatpush.bf16.msra.mxu2 %v1445_v21  ;;  %v1475_v9 = vld [vmem:[%s1867_s1 + $0x180] sm:$0xff]  ;;  %v233_v11 = vunpack.c.l.b16 %v17_v5  ;;  %v1514_v13 = vld [vmem:[%s1867_s1 + $0x2b8] sm:$0xff]  ;;  %v234_v17 = vunpack.c.h.b16 %v17_v5  ;;  %v1496_v28 = vld [vmem:[%s1867_s1 + $0x228] sm:$0xff] }
  0x18   :  { %877 = vmatpush.bf16.msra.mxu1 %v1437_v22  ;;  %v1467_v14 = vld [vmem:[%s1867_s1 + $0x140] sm:$0xff]  ;;  %v1506_v18 = vld [vmem:[%s1867_s1 + $0x278] sm:$0xff]  ;;  %v248_v20 = vpack.c.b16 %v235_v10, %v235_v10  ;;  %v1497_v22 = vld [vmem:[%s1867_s1 + $0x230] sm:$0xff] }
  0x19   :  { %903 = vmatpush.bf16.msra.mxu3 %v1453_v23  ;;  %v1483_v15 = vld [vmem:[%s1867_s1 + $0x1c0] sm:$0xff]  ;;  %v1522_v19 = vld [vmem:[%s1867_s1 + $0x2f8] sm:$0xff]  ;;  %v246_v21 = vpack.c.b16 %v233_v11, %v233_v11  ;;  %v1513_v23 = vld [vmem:[%s1867_s1 + $0x2b0] sm:$0xff] }
  0x1a   :  { %865 = vmatpush.bf16.msra.mxu0 %v1428_v24  ;;  %v249_v24 = vpack.c.b16 %v236_v16, %v236_v16  ;;  %v1512_v29 = vld [vmem:[%s1867_s1 + $0x2a8] sm:$0xff]  ;;  %v1495_v32 = vld [vmem:[%s1867_s1 + $0x220] sm:$0xff]  ;;  %v1502_v38 = vld [vmem:[%s1867_s1 + $0x258] sm:$0xff] }
  0x1b   :  { %891 = vmatpush.bf16.msra.mxu2 %v1444_v25  ;;  %v247_v25 = vpack.c.b16 %v234_v17, %v234_v17  ;;  %v1511_v33 = vld [vmem:[%s1867_s1 + $0x2a0] sm:$0xff]  ;;  %v1518_v39 = vld [vmem:[%s1867_s1 + $0x2d8] sm:$0xff] }
  0x1c   :  { %878 = vmatpush.bf16.msra.mxu1 %v1436_v26  ;;  %v1505_v26 = vld [vmem:[%s1867_s1 + $0x270] sm:$0xff]  ;;  %v1525_v11 = vld [vmem:[%s1868_s2] ss:$0 sm:$0xff] }
  0x1d   :  { %904 = vmatpush.bf16.msra.mxu3 %v1452_v27  ;;  %v1521_v27 = vld [vmem:[%s1867_s1 + $0x2f0] sm:$0xff] }
  0x1e   :  { %866 = vmatpush.bf16.msra.mxu0 %v1427_v30  ;;  %v1504_v30 = vld [vmem:[%s1867_s1 + $0x268] sm:$0xff] }
  0x1f   :  { %892 = vmatpush.bf16.msra.mxu2 %v1443_v31  ;;  %v1520_v31 = vld [vmem:[%s1867_s1 + $0x2e8] sm:$0xff] }
  0x20   :  { %879 = vmatpush.bf16.msra.mxu1 %v1435_v36  ;;  %v1494_v36 = vld [vmem:[%s1867_s1 + $0x218] sm:$0xff] }
  0x21   :  { %905 = vmatpush.bf16.msra.mxu3 %v1451_v37  ;;  %867 = vmatmul.bf16.vlgmr.msra.gmra.mxu0 %v242_v43  ;;  %v1510_v37 = vld [vmem:[%s1867_s1 + $0x298] sm:$0xff]  ;;  %v1517_v43 = vld [vmem:[%s1867_s1 + $0x2d0] sm:$0xff] }
  0x22   :  { %911 = vmatpush.bf16.msrb.mxu0 %v1466_v34  ;;  %893 = vmatmul.bf16.vlgmr.msra.gmra.mxu2 %v244_v42  ;;  %v1503_v34 = vld [vmem:[%s1867_s1 + $0x260] sm:$0xff]  ;;  %v1501_v42 = vld [vmem:[%s1867_s1 + $0x250] sm:$0xff] }
  0x23   :  { %937 = vmatpush.bf16.msrb.mxu2 %v1482_v35  ;;  %880 = vmatmul.bf16.vlgmr.msra.gmra.mxu1 %v243_v47  ;;  %v1519_v35 = vld [vmem:[%s1867_s1 + $0x2e0] sm:$0xff]  ;;  %v20_v47 = vld [vmem:[%s1869_s0 + $0x28] sm:$0xff] }
  0x24   :  { %924 = vmatpush.bf16.msrb.mxu1 %v1474_v40  ;;  %906 = vmatmul.bf16.vlgmr.msra.gmra.mxu3 %v245_v46  ;;  %v1493_v40 = vld [vmem:[%s1867_s1 + $0x210] sm:$0xff]  ;;  %v19_v46 = vld [vmem:[%s1869_s0 + $0x20] sm:$0xff] }
  0x25   :  { %950 = vmatpush.bf16.msrb.mxu3 %v1490_v41  ;;  %v1509_v41 = vld [vmem:[%s1867_s1 + $0x290] sm:$0xff] }
  0x26   :  { %912 = vmatpush.bf16.msrb.mxu0 %v1465_v44  ;;  %v1492_v44 = vld [vmem:[%s1867_s1 + $0x208] sm:$0xff] }
  0x27   :  { %938 = vmatpush.bf16.msrb.mxu2 %v1481_v45  ;;  %v1508_v45 = vld [vmem:[%s1867_s1 + $0x288] sm:$0xff] }
  0x28   :  { %925 = vmatpush.bf16.msrb.mxu1 %v1473_v48  ;;  %v1500_v48 = vld [vmem:[%s1867_s1 + $0x248] sm:$0xff] }
  0x29   :  { %951 = vmatpush.bf16.msrb.mxu3 %v1489_v49  ;;  %v1516_v49 = vld [vmem:[%s1867_s1 + $0x2c8] sm:$0xff] }
  0x2a   :  { %913 = vmatpush.bf16.msrb.mxu0 %v1464_v50  ;;  %v237_v50 = vunpack.c.l.b16 %v19_v46 }
  0x2b   :  { %939 = vmatpush.bf16.msrb.mxu2 %v1480_v51  ;;  %v239_v51 = vunpack.c.l.b16 %v20_v47 }
  0x2c   :  { %926 = vmatpush.bf16.msrb.mxu1 %v1472_v52  ;;  %v1491_v52 = vld [vmem:[%s1867_s1 + $0x200] sm:$0xff] }
  0x2d   :  { %952 = vmatpush.bf16.msrb.mxu3 %v1488_v53  ;;  %v1507_v53 = vld [vmem:[%s1867_s1 + $0x280] sm:$0xff] }
  0x2e   :  { %914 = vmatpush.bf16.msrb.mxu0 %v1463_v54  ;;  %v1524_v54 = vld [vmem:[%s1867_s1 + $0x308] sm:$0xff] }
  0x2f   :  { %940 = vmatpush.bf16.msrb.mxu2 %v1479_v55  ;;  %v238_v55 = vunpack.c.h.b16 %v19_v46 }
  0x30   :  { %927 = vmatpush.bf16.msrb.mxu1 %v1471_v56  ;;  %v240_v56 = vunpack.c.h.b16 %v20_v47 }
  0x31   :  { %953 = vmatpush.bf16.msrb.mxu3 %v1487_v57  ;;  %v1499_v57 = vld [vmem:[%s1867_s1 + $0x240] sm:$0xff] }
  0x32   :  { %915 = vmatpush.bf16.msrb.mxu0 %v1462_v58  ;;  %v1515_v58 = vld [vmem:[%s1867_s1 + $0x2c0] sm:$0xff] }
  0x33   :  { %941 = vmatpush.bf16.msrb.mxu2 %v1478_v59  ;;  %v250_v59 = vpack.c.b16 %v237_v50, %v237_v50 }
  0x34   :  { %928 = vmatpush.bf16.msrb.mxu1 %v1470_v60  ;;  %v252_v60 = vpack.c.b16 %v239_v51, %v239_v51 }
  0x35   :  { %954 = vmatpush.bf16.msrb.mxu3 %v1486_v61  ;;  %v251_v61 = vpack.c.b16 %v238_v55, %v238_v55 }
  0x36   :  { %916 = vmatpush.bf16.msrb.mxu0 %v1461_v62  ;;  %v253_v62 = vpack.c.b16 %v240_v56, %v240_v56 }
  0x37   :  { %942 = vmatpush.bf16.msrb.mxu2 %v1477_v63  ;;  %v1523_v63 = vld [vmem:[%s1867_s1 + $0x300] sm:$0xff] }
  0x38   :  { %929 = vmatpush.bf16.msrb.mxu1 %v1469_v0  ;;  %v21_v0 = vld [vmem:[%s1869_s0 + $0x30] sm:$0xf] }
  0x39   :  { %955 = vmatpush.bf16.msrb.mxu3 %v1485_v1  ;;  %v241_v1 = vunpack.c.l.b16 %v21_v0 }
  0x3a   :  { %917 = vmatpush.bf16.msrb.mxu0 %v1460_v2 }
  0x3b   :  { %943 = vmatpush.bf16.msrb.mxu2 %v1476_v3  ;;  %v254_v2 = vpack.c.b16 %v241_v1, %v241_v1 }
  0x3c   :  { %930 = vmatpush.bf16.msrb.mxu1 %v1468_v6 }
  0x3d   :  { %956 = vmatpush.bf16.msrb.mxu3 %v1484_v7 }
  0x3e   :  { %918 = vmatpush.bf16.msrb.mxu0 %v1459_v8 }
  0x3f   :  { %944 = vmatpush.bf16.msrb.mxu2 %v1475_v9 }
  0x40   :  { %931 = vmatpush.bf16.msrb.mxu1 %v1467_v14 }
  0x41   :  { %957 = vmatpush.bf16.msrb.mxu3 %v1483_v15  ;;  %919 = vmatmul.bf16.vlgmr.msrb.gmra.mxu0 %v246_v21 }
  0x42   :  { %963 = vmatpush.bf16.msra.mxu0 %v1498_v12  ;;  %945 = vmatmul.bf16.vlgmr.msrb.gmra.mxu2 %v248_v20 }
  0x43   :  { %989 = vmatpush.bf16.msra.mxu2 %v1514_v13  ;;  %932 = vmatmul.bf16.vlgmr.msrb.gmra.mxu1 %v247_v25 }
  0x44   :  { %976 = vmatpush.bf16.msra.mxu1 %v1506_v18  ;;  %958 = vmatmul.bf16.vlgmr.msrb.gmra.mxu3 %v249_v24 }
  0x45   :  { %1002 = vmatpush.bf16.msra.mxu3 %v1522_v19 }
  0x46   :  { %964 = vmatpush.bf16.msra.mxu0 %v1497_v22 }
  0x47   :  { %990 = vmatpush.bf16.msra.mxu2 %v1513_v23 }
  0x48   :  { %977 = vmatpush.bf16.msra.mxu1 %v1505_v26 }
  0x49   :  { %1003 = vmatpush.bf16.msra.mxu3 %v1521_v27 }
  0x4a   :  { %965 = vmatpush.bf16.msra.mxu0 %v1496_v28 }
  0x4b   :  { %991 = vmatpush.bf16.msra.mxu2 %v1512_v29 }
  0x4c   :  { %978 = vmatpush.bf16.msra.mxu1 %v1504_v30 }
  0x4d   :  { %1004 = vmatpush.bf16.msra.mxu3 %v1520_v31 }
  0x4e   :  { %966 = vmatpush.bf16.msra.mxu0 %v1495_v32 }
  0x4f   :  { %992 = vmatpush.bf16.msra.mxu2 %v1511_v33 }
  0x50   :  { %979 = vmatpush.bf16.msra.mxu1 %v1503_v34 }
  0x51   :  { %1005 = vmatpush.bf16.msra.mxu3 %v1519_v35 }
  0x52   :  { %967 = vmatpush.bf16.msra.mxu0 %v1494_v36 }
  0x53   :  { %993 = vmatpush.bf16.msra.mxu2 %v1510_v37 }
  0x54   :  { %980 = vmatpush.bf16.msra.mxu1 %v1502_v38 }
  0x55   :  { %1006 = vmatpush.bf16.msra.mxu3 %v1518_v39 }
  0x56   :  { %968 = vmatpush.bf16.msra.mxu0 %v1493_v40 }
  0x57   :  { %994 = vmatpush.bf16.msra.mxu2 %v1509_v41 }
  0x58   :  { %981 = vmatpush.bf16.msra.mxu1 %v1501_v42 }
  0x59   :  { %1007 = vmatpush.bf16.msra.mxu3 %v1517_v43 }
  0x5a   :  { %969 = vmatpush.bf16.msra.mxu0 %v1492_v44 }
  0x5b   :  { %995 = vmatpush.bf16.msra.mxu2 %v1508_v45 }
  0x5c   :  { %982 = vmatpush.bf16.msra.mxu1 %v1500_v48 }
  0x5d   :  { %1008 = vmatpush.bf16.msra.mxu3 %v1516_v49 }
  0x5e   :  { %970 = vmatpush.bf16.msra.mxu0 %v1491_v52 }
  0x5f   :  { %996 = vmatpush.bf16.msra.mxu2 %v1507_v53 }
  0x60   :  { %983 = vmatpush.bf16.msra.mxu1 %v1499_v57 }
  0x61   :  { %1009 = vmatpush.bf16.msra.mxu3 %v1515_v58  ;;  %971 = vmatmul.bf16.vlgmr.msra.gmra.mxu0 %v250_v59 }
  0x62   :  { %1021 = vmatpush.bf16.msrb.mxu0 %v1524_v54  ;;  %997 = vmatmul.bf16.vlgmr.msra.gmra.mxu2 %v252_v60 }
  0x63   :  { %984 = vmatmul.bf16.vlgmr.msra.gmra.mxu1 %v251_v61 }
  0x64   :  { %1010 = vmatmul.bf16.vlgmr.msra.gmra.mxu3 %v253_v62 }
  0x66   :  { %1022 = vmatpush.bf16.msrb.mxu0 %v1523_v63 }
  0x71   :  { %1426 = vmatmul.msk.bf16.vlgmr.msrb.gmra.mxu0 %vm855_vm0, %v254_v2 }
  0x9e   :  { %v868_v3 = vpop.f32.mrf.mxu0 }
  0x9f   :  { %v869_v14 = vadd.f32 %v1525_v11, %v868_v3 }
  0xa0   :  { %v881_v4 = vpop.f32.mrf.mxu1 }
  0xa1   :  { %v882_v16 = vadd.f32 %v881_v4, %v869_v14 }
  0xa5   :  { %v894_v5 = vpop.f32.mrf.mxu2 }
  0xa6   :  { %v870_v7 = vpop.f32.mrf.mxu0  ;;  %v895_v20 = vadd.f32 %v894_v5, %v882_v16 }
  0xa7   :  { %v907_v6 = vpop.f32.mrf.mxu3 }
  0xa8   :  { %v883_v8 = vpop.f32.mrf.mxu1  ;;  %v908_v22 = vadd.f32 %v907_v6, %v895_v20 }
  0xad   :  { %v896_v9 = vpop.f32.mrf.mxu2 }
  0xaf   :  { %v909_v10 = vpop.f32.mrf.mxu3 }
  0xbe   :  { %v920_v12 = vpop.f32.mrf.mxu0 }
  0xbf   :  { %v921_v24 = vadd.f32 %v920_v12, %v908_v22 }
  0xc0   :  { %v933_v13 = vpop.f32.mrf.mxu1 }
  0xc1   :  { %v934_v25 = vadd.f32 %v933_v13, %v921_v24 }
  0xc5   :  { %v946_v15 = vpop.f32.mrf.mxu2 }
  0xc6   :  { %v922_v18 = vpop.f32.mrf.mxu0  ;;  %v947_v26 = vadd.f32 %v946_v15, %v934_v25 }
  0xc7   :  { %v959_v17 = vpop.f32.mrf.mxu3 }
  0xc8   :  { %v935_v19 = vpop.f32.mrf.mxu1  ;;  %v960_v29 = vadd.f32 %v959_v17, %v947_v26 }
  0xcd   :  { %v948_v21 = vpop.f32.mrf.mxu2 }
  0xcf   :  { %v961_v23 = vpop.f32.mrf.mxu3 }
  0xde   :  { %v972_v27 = vpop.f32.mrf.mxu0 }
  0xdf   :  { %v973_v30 = vadd.f32 %v972_v27, %v960_v29 }
  0xe0   :  { %v985_v28 = vpop.f32.mrf.mxu1 }
  0xe1   :  { %v986_v34 = vadd.f32 %v985_v28, %v973_v30 }
  0xe5   :  { %v998_v31 = vpop.f32.mrf.mxu2 }
  0xe6   :  { %v974_v32 = vpop.f32.mrf.mxu0  ;;  %v999_v36 = vadd.f32 %v998_v31, %v986_v34 }
  0xe7   :  { %v1011_v33 = vpop.f32.mrf.mxu3 }
  0xe8   :  { %v987_v35 = vpop.f32.mrf.mxu1  ;;  %v1012_v38 = vadd.f32 %v1011_v33, %v999_v36 }
  0xed   :  { %v1000_v37 = vpop.f32.mrf.mxu2 }
  0xee   :  { %v1024_v40 = vpop.f32.mrf.mxu0 }
  0xef   :  { %v1013_v39 = vpop.f32.mrf.mxu3  ;;  %v1025_v41 = vadd.f32 %v1024_v40, %v1012_v38 }
  0xf1   :  { %1029 = vst.msk [vmem:[%s1870_s3] sm:$0xff] %vm1028_vm1, %v1025_v41 }
  0xf6   :  { %v1026_v42 = vpop.f32.mrf.mxu0 }

</bundles_post_ra>
